<compile_context>
chip_gen: v6e
topology: v6e:2x2x1
jax: 0.10.0
libtpu: 0.0.40
codegen_flags: <defaults>
</compile_context>

<pallas_src>
import jax
import jax.numpy as jnp
from jax.experimental import pallas as pl
from jax.experimental.pallas import tpu as pltpu


def sto_enc_kernel(x_ref, adj_ref, sw_ref, assign_ref, assign_t_ref,
                   w0_ref, b0_ref, w1_ref, b1_ref,
                   wih_ref, blstm_ref, wlin_ref, blin_ref,
                   out_ref):
    f32 = jnp.float32
    x = x_ref[...]                      # (N, Din)
    adj = adj_ref[...]                  # (N, N) normalized adjacency
    sw = sw_ref[...]                    # (N, 1)  sto_weight
    assign = assign_ref[...]            # (B, N)  one-hot of batch assignment
    assign_t = assign_t_ref[...]        # (N, B)

    # ---------------- GCN: 2 layers, h = ReLU(A_hat h W + b) ----------------
    h = jnp.dot(adj, x, preferred_element_type=f32)
    h = jnp.maximum(jnp.dot(h, w0_ref[...], preferred_element_type=f32)
                    + b0_ref[...], 0.0)
    h = jnp.dot(adj, h, preferred_element_type=f32)
    h = jnp.maximum(jnp.dot(h, w1_ref[...], preferred_element_type=f32)
                    + b1_ref[...], 0.0)                      # (N, H)

    # -------- weighted node features + scatter_sum (graph pooling) --------
    wx = h * sw                                              # (N, H)
    sto = jnp.dot(assign, wx, preferred_element_type=f32)    # (B, H)

    # -------- Set2Set: 2 processing steps, 1-layer LSTM --------
    B = assign.shape[0]
    H = wx.shape[1]
    q = jnp.zeros((B, H), f32)          # q_star = [q, r], starts at zero
    r = jnp.zeros((B, H), f32)
    h_lstm = jnp.zeros((B, H), f32)
    c_lstm = jnp.zeros((B, H), f32)
    wih = wih_ref[...]                  # (3H, 4H) fused [W_q; W_r; W_hh]
    blstm = blstm_ref[...]              # (1, 4H)

    for _ in range(2):                  # num_step_set2set = 2 (static unroll)
        # single fused MXU push for the three LSTM input matmuls
        qrh = jnp.concatenate([q, r, h_lstm], axis=-1)       # (B, 3H)
        gates = jnp.dot(qrh, wih, preferred_element_type=f32) + blstm   # (B, 4H)
        i_g = jax.nn.sigmoid(gates[:, 0:H])
        f_g = jax.nn.sigmoid(gates[:, H:2 * H])
        g_g = jnp.tanh(gates[:, 2 * H:3 * H])
        o_g = jax.nn.sigmoid(gates[:, 3 * H:4 * H])
        c_lstm = f_g * c_lstm + i_g * g_g
        h_lstm = o_g * jnp.tanh(c_lstm)
        q = h_lstm                                           # (B, H)

        # attention: e_n = <wx_n, q_{batch[n]}>; softmax per graph.
        # scores stays on the MXU; membership mask replaces the (N,H) gather.
        scores = jax.lax.dot_general(
            wx, q, (((1,), (1,)), ((), ())),
            preferred_element_type=f32)                      # (N, B)
        e = jnp.sum(scores * assign_t, axis=-1, keepdims=True)   # (N, 1)
        e = e - jnp.max(e)              # global shift cancels per segment
        exp_e = jnp.exp(e)
        denom = jnp.dot(assign, exp_e, preferred_element_type=f32)      # (B, 1)
        num = jnp.dot(assign, exp_e * wx, preferred_element_type=f32)   # (B, H)
        # per-graph normalization factored out of the segment sum (EUP reciprocal)
        r = num * pl.reciprocal(denom, approx=True)          # (B, H)

    # -------- mean = mean_lin([q, r]) + sto  (fused single matmul) --------
    qr = jnp.concatenate([q, r], axis=-1)                    # (B, 2H)
    out = (jnp.dot(qr, wlin_ref[...], preferred_element_type=f32)
           + blin_ref[...] + sto)
    out_ref[...] = out


def _cost_estimate(G, N, B, DIN, H, bytes_accessed, steps=2):
    per_slab_flops = (
        2 * N * N * DIN + 2 * N * DIN * H          # GCN layer 0
        + 2 * N * N * H + 2 * N * H * H            # GCN layer 1
        + 2 * B * N * H                            # scatter_sum pooling
        + steps * (2 * B * (3 * H) * (4 * H)       # fused LSTM matmul
                   + 2 * N * H * B                 # attention scores
                   + 2 * B * N                     # softmax denominator
                   + 2 * B * N * H)                # weighted readout
        + 2 * B * (2 * H) * H                      # head
    )
    per_slab_trans = steps * (5 * B * H + N)       # sigmoid/tanh/exp (approx)
    return pl.CostEstimate(
        flops=G * per_slab_flops,
        transcendentals=G * per_slab_trans,
        bytes_accessed=bytes_accessed,
    )


def sto_enc_forward(x_emb, adj, sw, assign, params):
    """x_emb: (G,N,Din)  adj: (G,N,N)  sw: (G,N,1)  assign: (G,B,N)."""
    G, N, DIN = x_emb.shape
    B = assign.shape[1]
    H = params["w0"].shape[1]
    assign_t = jnp.swapaxes(assign, 1, 2)                    # (G, N, B)

    args = (x_emb, adj, sw, assign, assign_t,
            params["w0"], params["b0"], params["w1"], params["b1"],
            params["wih"], params["blstm"], params["wlin"], params["blin"])

    def slab(shape):   # per-graph-batch tensors: leading grid dim squeezed out
        return pl.BlockSpec((None,) + shape, lambda g: (g,) + (0,) * len(shape))

    def fixed(shape):  # weights: same block every step -> fetched once, stays resident
        return pl.BlockSpec(shape, lambda g: (0,) * len(shape))

    in_specs = [
        slab((N, DIN)), slab((N, N)), slab((N, 1)), slab((B, N)), slab((N, B)),
        fixed(params["w0"].shape), fixed(params["b0"].shape),
        fixed(params["w1"].shape), fixed(params["b1"].shape),
        fixed(params["wih"].shape), fixed(params["blstm"].shape),
        fixed(params["wlin"].shape), fixed(params["blin"].shape),
    ]
    out_specs = pl.BlockSpec((None, B, H), lambda g: (g, 0, 0))

    bytes_accessed = (sum(int(a.size) * a.dtype.itemsize for a in args)
                      + G * B * H * 4)

    return pl.pallas_call(
        sto_enc_kernel,
        grid=(G,),
        out_shape=jax.ShapeDtypeStruct((G, B, H), jnp.float32),
        in_specs=in_specs,
        out_specs=out_specs,
        compiler_params=pltpu.CompilerParams(
            dimension_semantics=("parallel",)),
        cost_estimate=_cost_estimate(G, N, B, DIN, H, bytes_accessed),
    )(*args)


def xavier_uniform(key, shape):
    fan_in, fan_out = shape
    bound = (6.0 / (fan_in + fan_out)) ** 0.5
    return jax.random.uniform(key, shape, jnp.float32, -bound, bound)


def init_params(key, din, hidden):
    ks = jax.random.split(key, 7)
    H = hidden
    wih_q = 0.1 * jax.random.normal(ks[2], (H, 4 * H), jnp.float32)
    wih_r = 0.1 * jax.random.normal(ks[3], (H, 4 * H), jnp.float32)
    whh = 0.1 * jax.random.normal(ks[4], (H, 4 * H), jnp.float32)
    return {
        # GCN layer weights (xavier), zero biases
        "w0": xavier_uniform(ks[0], (din, H)),
        "b0": jnp.zeros((1, H), jnp.float32),
        "w1": xavier_uniform(ks[1], (H, H)),
        "b1": jnp.zeros((1, H), jnp.float32),
        # Set2Set LSTM: fused input/hidden weight [W_q; W_r; W_hh] -> (3H, 4H)
        "wih": jnp.concatenate([wih_q, wih_r, whh], axis=0),
        "blstm": jnp.zeros((1, 4 * H), jnp.float32),
        # mean_lin: single Linear(2H -> H), xavier, zero bias (single draw)
        "wlin": xavier_uniform(ks[5], (2 * H, H)),
        "blin": jnp.zeros((1, H), jnp.float32),
    }


def build_adjacency(edge_index, n_nodes):
    src, dst = edge_index[0], edge_index[1]
    a = jnp.zeros((n_nodes, n_nodes), jnp.float32).at[src, dst].set(1.0)
    a = jnp.maximum(a, a.T) + jnp.eye(n_nodes, dtype=jnp.float32)  # sym + self loops
    deg = jnp.sum(a, axis=-1)
    d_inv_sqrt = 1.0 / jnp.sqrt(deg)
    return a * d_inv_sqrt[:, None] * d_inv_sqrt[None, :]


if __name__ == "__main__":
    key = jax.random.PRNGKey(0)
    k_data, k_param = jax.random.split(key)
    kd = jax.random.split(k_data, 5)

    G = 4                               # independent graph-batch slabs per call
    VOCAB, DIN, HIDDEN = 10, 16, 128    # H=128 -> lane-aligned gates / output
    N_NODES, N_GRAPHS, N_EDGES = 16, 2, 24

    # synthetic `data` fields + external embedding table, batched over G slabs
    sto_x = jax.random.randint(kd[0], (G, N_NODES), 1, VOCAB + 1)      # 1-based ids
    sto_edge_index = jax.random.randint(kd[1], (G, 2, N_EDGES), 0, N_NODES)
    sto_weight = jax.random.uniform(kd[2], (G, N_NODES), jnp.float32)
    sto_batch = jnp.broadcast_to(
        jnp.concatenate([jnp.zeros(8, jnp.int32), jnp.ones(8, jnp.int32)]),
        (G, N_NODES))
    emb_table = jax.random.normal(kd[3], (VOCAB, DIN), jnp.float32)

    params = init_params(k_param, DIN, HIDDEN)

    # glue (plain JAX): embedding gather, normalized adjacency, batch one-hot
    x_emb = emb_table[sto_x - 1]                                       # (G, N, Din)
    adj = jax.vmap(lambda ei: build_adjacency(ei, N_NODES))(sto_edge_index)
    sw = sto_weight[..., None]                                         # (G, N, 1)
    assign = jax.vmap(
        lambda b: jax.nn.one_hot(b, N_GRAPHS, dtype=jnp.float32).T)(sto_batch)

    out = sto_enc_forward(x_emb, adj, sw, assign, params)
    out = jax.block_until_ready(out)
    assert out.shape == (G, N_GRAPHS, HIDDEN)
    assert bool(jnp.all(jnp.isfinite(out)))
    print("KERNEL_OK")
</pallas_src>

<mosaic_0001>
module attributes {stable_mosaic.version = 11 : i64} {
  func.func @sto_enc_kernel(%arg0: i32, %arg1: memref<1x16x16xf32, #tpu.memory_space<vmem>>, %arg2: memref<1x16x16xf32, #tpu.memory_space<vmem>>, %arg3: memref<1x16x1xf32, #tpu.memory_space<vmem>>, %arg4: memref<1x2x16xf32, #tpu.memory_space<vmem>>, %arg5: memref<1x16x2xf32, #tpu.memory_space<vmem>>, %arg6: memref<16x128xf32, #tpu.memory_space<vmem>>, %arg7: memref<1x128xf32, #tpu.memory_space<vmem>>, %arg8: memref<128x128xf32, #tpu.memory_space<vmem>>, %arg9: memref<1x128xf32, #tpu.memory_space<vmem>>, %arg10: memref<384x512xf32, #tpu.memory_space<vmem>>, %arg11: memref<1x512xf32, #tpu.memory_space<vmem>>, %arg12: memref<256x128xf32, #tpu.memory_space<vmem>>, %arg13: memref<1x128xf32, #tpu.memory_space<vmem>>, %arg14: memref<1x2x128xf32, #tpu.memory_space<vmem>>) attributes {dimension_semantics = [#tpu.dimension_semantics<parallel>], iteration_bounds = array<i64: 4>, scalar_prefetch = 0 : i64, scratch_operands = 0 : i64, tpu.core_type = #tpu.core_type<tc>, window_params = [{transform_indices = @transform_0, window_bounds = array<i64: 1, 16, 16>}, {transform_indices = @transform_1, window_bounds = array<i64: 1, 16, 16>}, {transform_indices = @transform_2, window_bounds = array<i64: 1, 16, 1>}, {transform_indices = @transform_3, window_bounds = array<i64: 1, 2, 16>}, {transform_indices = @transform_4, window_bounds = array<i64: 1, 16, 2>}, {pipeline_mode = #tpu.pipeline_mode<synchronous>, transform_indices = @transform_5, window_bounds = array<i64: 16, 128>}, {pipeline_mode = #tpu.pipeline_mode<synchronous>, transform_indices = @transform_6, window_bounds = array<i64: 1, 128>}, {pipeline_mode = #tpu.pipeline_mode<synchronous>, transform_indices = @transform_7, window_bounds = array<i64: 128, 128>}, {pipeline_mode = #tpu.pipeline_mode<synchronous>, transform_indices = @transform_8, window_bounds = array<i64: 1, 128>}, {pipeline_mode = #tpu.pipeline_mode<synchronous>, transform_indices = @transform_9, window_bounds = array<i64: 384, 512>}, {pipeline_mode = #tpu.pipeline_mode<synchronous>, transform_indices = @transform_10, window_bounds = array<i64: 1, 512>}, {pipeline_mode = #tpu.pipeline_mode<synchronous>, transform_indices = @transform_11, window_bounds = array<i64: 256, 128>}, {pipeline_mode = #tpu.pipeline_mode<synchronous>, transform_indices = @transform_12, window_bounds = array<i64: 1, 128>}, {transform_indices = @transform_13, window_bounds = array<i64: 1, 2, 128>}]} {
    %c0 = arith.constant 0 : index
    %c0_0 = arith.constant 0 : index
    %c0_1 = arith.constant 0 : index
    %0 = vector.load %arg1[%c0, %c0_0, %c0_1] : memref<1x16x16xf32, #tpu.memory_space<vmem>>, vector<1x16x16xf32>
    %1 = vector.shape_cast %0 : vector<1x16x16xf32> to vector<16x16xf32>
    %c0_2 = arith.constant 0 : index
    %c0_3 = arith.constant 0 : index
    %c0_4 = arith.constant 0 : index
    %2 = vector.load %arg2[%c0_2, %c0_3, %c0_4] : memref<1x16x16xf32, #tpu.memory_space<vmem>>, vector<1x16x16xf32>
    %3 = vector.shape_cast %2 : vector<1x16x16xf32> to vector<16x16xf32>
    %c0_5 = arith.constant 0 : index
    %c0_6 = arith.constant 0 : index
    %c0_7 = arith.constant 0 : index
    %4 = vector.load %arg3[%c0_5, %c0_6, %c0_7] : memref<1x16x1xf32, #tpu.memory_space<vmem>>, vector<1x16x1xf32>
    %5 = vector.shape_cast %4 : vector<1x16x1xf32> to vector<16x1xf32>
    %c0_8 = arith.constant 0 : index
    %c0_9 = arith.constant 0 : index
    %c0_10 = arith.constant 0 : index
    %6 = vector.load %arg4[%c0_8, %c0_9, %c0_10] : memref<1x2x16xf32, #tpu.memory_space<vmem>>, vector<1x2x16xf32>
    %7 = vector.shape_cast %6 : vector<1x2x16xf32> to vector<2x16xf32>
    %c0_11 = arith.constant 0 : index
    %c0_12 = arith.constant 0 : index
    %c0_13 = arith.constant 0 : index
    %8 = vector.load %arg5[%c0_11, %c0_12, %c0_13] : memref<1x16x2xf32, #tpu.memory_space<vmem>>, vector<1x16x2xf32>
    %9 = vector.shape_cast %8 : vector<1x16x2xf32> to vector<16x2xf32>
    %cst = arith.constant dense<0.000000e+00> : vector<16x16xf32>
    %10 = tpu.matmul %3, %1, %cst {dimension_numbers = #tpu.dot_dimension_numbers<[1], [0], [0], [1], [0, 0, 1, 1], [], []>} : vector<16x16xf32>, vector<16x16xf32>, vector<16x16xf32> -> vector<16x16xf32>
    %c0_14 = arith.constant 0 : index
    %c0_15 = arith.constant 0 : index
    %11 = vector.load %arg6[%c0_14, %c0_15] : memref<16x128xf32, #tpu.memory_space<vmem>>, vector<16x128xf32>
    %cst_16 = arith.constant dense<0.000000e+00> : vector<16x128xf32>
    %12 = tpu.matmul %10, %11, %cst_16 {dimension_numbers = #tpu.dot_dimension_numbers<[1], [0], [0], [1], [0, 0, 1, 1], [], []>} : vector<16x16xf32>, vector<16x128xf32>, vector<16x128xf32> -> vector<16x128xf32>
    %c0_17 = arith.constant 0 : index
    %c0_18 = arith.constant 0 : index
    %13 = vector.load %arg7[%c0_17, %c0_18] : memref<1x128xf32, #tpu.memory_space<vmem>>, vector<1x128xf32>
    %14 = vector.broadcast %13 : vector<1x128xf32> to vector<16x128xf32>
    %15 = arith.addf %12, %14 : vector<16x128xf32>
    %cst_19 = arith.constant 0.000000e+00 : f32
    %16 = vector.broadcast %cst_19 : f32 to vector<16x128xf32>
    %17 = arith.maximumf %15, %16 : vector<16x128xf32>
    %cst_20 = arith.constant dense<0.000000e+00> : vector<16x128xf32>
    %18 = tpu.matmul %3, %17, %cst_20 {dimension_numbers = #tpu.dot_dimension_numbers<[1], [0], [0], [1], [0, 0, 1, 1], [], []>} : vector<16x16xf32>, vector<16x128xf32>, vector<16x128xf32> -> vector<16x128xf32>
    %c0_21 = arith.constant 0 : index
    %c0_22 = arith.constant 0 : index
    %19 = vector.load %arg8[%c0_21, %c0_22] : memref<128x128xf32, #tpu.memory_space<vmem>>, vector<128x128xf32>
    %cst_23 = arith.constant dense<0.000000e+00> : vector<16x128xf32>
    %20 = tpu.matmul %18, %19, %cst_23 {dimension_numbers = #tpu.dot_dimension_numbers<[1], [0], [0], [1], [0, 0, 1, 1], [], []>} : vector<16x128xf32>, vector<128x128xf32>, vector<16x128xf32> -> vector<16x128xf32>
    %c0_24 = arith.constant 0 : index
    %c0_25 = arith.constant 0 : index
    %21 = vector.load %arg9[%c0_24, %c0_25] : memref<1x128xf32, #tpu.memory_space<vmem>>, vector<1x128xf32>
    %22 = vector.broadcast %21 : vector<1x128xf32> to vector<16x128xf32>
    %23 = arith.addf %20, %22 : vector<16x128xf32>
    %cst_26 = arith.constant 0.000000e+00 : f32
    %24 = vector.broadcast %cst_26 : f32 to vector<16x128xf32>
    %25 = arith.maximumf %23, %24 : vector<16x128xf32>
    %26 = vector.broadcast %5 : vector<16x1xf32> to vector<16x128xf32>
    %27 = arith.mulf %25, %26 : vector<16x128xf32>
    %cst_27 = arith.constant dense<0.000000e+00> : vector<2x128xf32>
    %28 = tpu.matmul %7, %27, %cst_27 {dimension_numbers = #tpu.dot_dimension_numbers<[1], [0], [0], [1], [0, 0, 1, 1], [], []>} : vector<2x16xf32>, vector<16x128xf32>, vector<2x128xf32> -> vector<2x128xf32>
    %cst_28 = arith.constant 0.000000e+00 : f32
    %29 = vector.broadcast %cst_28 : f32 to vector<2x128xf32>
    %cst_29 = arith.constant 0.000000e+00 : f32
    %30 = vector.broadcast %cst_29 : f32 to vector<2x128xf32>
    %cst_30 = arith.constant 0.000000e+00 : f32
    %31 = vector.broadcast %cst_30 : f32 to vector<2x128xf32>
    %cst_31 = arith.constant 0.000000e+00 : f32
    %32 = vector.broadcast %cst_31 : f32 to vector<2x128xf32>
    %c0_32 = arith.constant 0 : index
    %c0_33 = arith.constant 0 : index
    %33 = vector.load %arg10[%c0_32, %c0_33] : memref<384x512xf32, #tpu.memory_space<vmem>>, vector<384x512xf32>
    %c0_34 = arith.constant 0 : index
    %c0_35 = arith.constant 0 : index
    %34 = vector.load %arg11[%c0_34, %c0_35] : memref<1x512xf32, #tpu.memory_space<vmem>>, vector<1x512xf32>
    %35 = tpu.concatenate %29, %30, %31 in 1 : vector<2x128xf32>, vector<2x128xf32>, vector<2x128xf32> -> vector<2x384xf32>
    %cst_36 = arith.constant dense<0.000000e+00> : vector<2x512xf32>
    %36 = tpu.matmul %35, %33, %cst_36 {dimension_numbers = #tpu.dot_dimension_numbers<[1], [0], [0], [1], [0, 0, 1, 1], [], []>} : vector<2x384xf32>, vector<384x512xf32>, vector<2x512xf32> -> vector<2x512xf32>
    %37 = vector.broadcast %34 : vector<1x512xf32> to vector<2x512xf32>
    %38 = arith.addf %36, %37 : vector<2x512xf32>
    %39 = vector.extract_strided_slice %38 {offsets = [0, 0], sizes = [2, 128], strides = [1, 1]} : vector<2x512xf32> to vector<2x128xf32>
    %40 = arith.negf %39 : vector<2x128xf32>
    %41 = math.exp %40 : vector<2x128xf32>
    %cst_37 = arith.constant 1.000000e+00 : f32
    %42 = vector.broadcast %cst_37 : f32 to vector<2x128xf32>
    %43 = arith.addf %42, %41 : vector<2x128xf32>
    %44 = arith.divf %42, %43 : vector<2x128xf32>
    %45 = vector.extract_strided_slice %38 {offsets = [0, 128], sizes = [2, 128], strides = [1, 1]} : vector<2x512xf32> to vector<2x128xf32>
    %46 = arith.negf %45 : vector<2x128xf32>
    %47 = math.exp %46 : vector<2x128xf32>
    %cst_38 = arith.constant 1.000000e+00 : f32
    %48 = vector.broadcast %cst_38 : f32 to vector<2x128xf32>
    %49 = arith.addf %48, %47 : vector<2x128xf32>
    %50 = arith.divf %48, %49 : vector<2x128xf32>
    %51 = vector.extract_strided_slice %38 {offsets = [0, 256], sizes = [2, 128], strides = [1, 1]} : vector<2x512xf32> to vector<2x128xf32>
    %52 = math.tanh %51 : vector<2x128xf32>
    %53 = vector.extract_strided_slice %38 {offsets = [0, 384], sizes = [2, 128], strides = [1, 1]} : vector<2x512xf32> to vector<2x128xf32>
    %54 = arith.negf %53 : vector<2x128xf32>
    %55 = math.exp %54 : vector<2x128xf32>
    %cst_39 = arith.constant 1.000000e+00 : f32
    %56 = vector.broadcast %cst_39 : f32 to vector<2x128xf32>
    %57 = arith.addf %56, %55 : vector<2x128xf32>
    %58 = arith.divf %56, %57 : vector<2x128xf32>
    %59 = arith.mulf %50, %32 : vector<2x128xf32>
    %60 = arith.mulf %44, %52 : vector<2x128xf32>
    %61 = arith.addf %59, %60 : vector<2x128xf32>
    %62 = math.tanh %61 : vector<2x128xf32>
    %63 = arith.mulf %58, %62 : vector<2x128xf32>
    %cst_40 = arith.constant dense<0.000000e+00> : vector<16x2xf32>
    %64 = tpu.matmul %27, %63, %cst_40 {dimension_numbers = #tpu.dot_dimension_numbers<[1], [1], [0], [0], [0, 0, 1, 0], [], []>} : vector<16x128xf32>, vector<2x128xf32>, vector<16x2xf32> -> vector<16x2xf32>
    %65 = arith.mulf %64, %9 : vector<16x2xf32>
    %cst_41 = arith.constant dense<0.000000e+00> : vector<16xf32>
    %66 = vector.multi_reduction <add>, %65, %cst_41 [1] : vector<16x2xf32> to vector<16xf32>
    %67 = vector.shape_cast %66 : vector<16xf32> to vector<16x1xf32>
    %68 = vector.shape_cast %67 : vector<16x1xf32> to vector<1x16x1xf32>
    %cst_42 = arith.constant dense<0xFF800000> : vector<1xf32>
    %69 = vector.multi_reduction <maximumf>, %68, %cst_42 [1, 2] : vector<1x16x1xf32> to vector<1xf32>
    %70 = vector.shape_cast %69 : vector<1xf32> to vector<1x1x1xf32>
    %71 = vector.extract %70[0, 0, 0] : f32 from vector<1x1x1xf32>
    %72 = vector.broadcast %71 : f32 to vector<16x1xf32>
    %73 = arith.subf %67, %72 : vector<16x1xf32>
    %74 = math.exp %73 : vector<16x1xf32>
    %cst_43 = arith.constant dense<0.000000e+00> : vector<2x1xf32>
    %75 = tpu.matmul %7, %74, %cst_43 {dimension_numbers = #tpu.dot_dimension_numbers<[1], [0], [0], [1], [0, 0, 1, 1], [], []>} : vector<2x16xf32>, vector<16x1xf32>, vector<2x1xf32> -> vector<2x1xf32>
    %76 = vector.broadcast %74 : vector<16x1xf32> to vector<16x128xf32>
    %77 = arith.mulf %76, %27 : vector<16x128xf32>
    %cst_44 = arith.constant dense<0.000000e+00> : vector<2x128xf32>
    %78 = tpu.matmul %7, %77, %cst_44 {dimension_numbers = #tpu.dot_dimension_numbers<[1], [0], [0], [1], [0, 0, 1, 1], [], []>} : vector<2x16xf32>, vector<16x128xf32>, vector<2x128xf32> -> vector<2x128xf32>
    %79 = tpu.reciprocal %75 {approx = true} : vector<2x1xf32> -> vector<2x1xf32>
    %80 = vector.broadcast %79 : vector<2x1xf32> to vector<2x128xf32>
    %81 = arith.mulf %78, %80 : vector<2x128xf32>
    %82 = tpu.concatenate %63, %81, %63 in 1 : vector<2x128xf32>, vector<2x128xf32>, vector<2x128xf32> -> vector<2x384xf32>
    %cst_45 = arith.constant dense<0.000000e+00> : vector<2x512xf32>
    %83 = tpu.matmul %82, %33, %cst_45 {dimension_numbers = #tpu.dot_dimension_numbers<[1], [0], [0], [1], [0, 0, 1, 1], [], []>} : vector<2x384xf32>, vector<384x512xf32>, vector<2x512xf32> -> vector<2x512xf32>
    %84 = vector.broadcast %34 : vector<1x512xf32> to vector<2x512xf32>
    %85 = arith.addf %83, %84 : vector<2x512xf32>
    %86 = vector.extract_strided_slice %85 {offsets = [0, 0], sizes = [2, 128], strides = [1, 1]} : vector<2x512xf32> to vector<2x128xf32>
    %87 = arith.negf %86 : vector<2x128xf32>
    %88 = math.exp %87 : vector<2x128xf32>
    %cst_46 = arith.constant 1.000000e+00 : f32
    %89 = vector.broadcast %cst_46 : f32 to vector<2x128xf32>
    %90 = arith.addf %89, %88 : vector<2x128xf32>
    %91 = arith.divf %89, %90 : vector<2x128xf32>
    %92 = vector.extract_strided_slice %85 {offsets = [0, 128], sizes = [2, 128], strides = [1, 1]} : vector<2x512xf32> to vector<2x128xf32>
    %93 = arith.negf %92 : vector<2x128xf32>
    %94 = math.exp %93 : vector<2x128xf32>
    %cst_47 = arith.constant 1.000000e+00 : f32
    %95 = vector.broadcast %cst_47 : f32 to vector<2x128xf32>
    %96 = arith.addf %95, %94 : vector<2x128xf32>
    %97 = arith.divf %95, %96 : vector<2x128xf32>
    %98 = vector.extract_strided_slice %85 {offsets = [0, 256], sizes = [2, 128], strides = [1, 1]} : vector<2x512xf32> to vector<2x128xf32>
    %99 = math.tanh %98 : vector<2x128xf32>
    %100 = vector.extract_strided_slice %85 {offsets = [0, 384], sizes = [2, 128], strides = [1, 1]} : vector<2x512xf32> to vector<2x128xf32>
    %101 = arith.negf %100 : vector<2x128xf32>
    %102 = math.exp %101 : vector<2x128xf32>
    %cst_48 = arith.constant 1.000000e+00 : f32
    %103 = vector.broadcast %cst_48 : f32 to vector<2x128xf32>
    %104 = arith.addf %103, %102 : vector<2x128xf32>
    %105 = arith.divf %103, %104 : vector<2x128xf32>
    %106 = arith.mulf %97, %61 : vector<2x128xf32>
    %107 = arith.mulf %91, %99 : vector<2x128xf32>
    %108 = arith.addf %106, %107 : vector<2x128xf32>
    %109 = math.tanh %108 : vector<2x128xf32>
    %110 = arith.mulf %105, %109 : vector<2x128xf32>
    %cst_49 = arith.constant dense<0.000000e+00> : vector<16x2xf32>
    %111 = tpu.matmul %27, %110, %cst_49 {dimension_numbers = #tpu.dot_dimension_numbers<[1], [1], [0], [0], [0, 0, 1, 0], [], []>} : vector<16x128xf32>, vector<2x128xf32>, vector<16x2xf32> -> vector<16x2xf32>
    %112 = arith.mulf %111, %9 : vector<16x2xf32>
    %cst_50 = arith.constant dense<0.000000e+00> : vector<16xf32>
    %113 = vector.multi_reduction <add>, %112, %cst_50 [1] : vector<16x2xf32> to vector<16xf32>
    %114 = vector.shape_cast %113 : vector<16xf32> to vector<16x1xf32>
    %115 = vector.shape_cast %114 : vector<16x1xf32> to vector<1x16x1xf32>
    %cst_51 = arith.constant dense<0xFF800000> : vector<1xf32>
    %116 = vector.multi_reduction <maximumf>, %115, %cst_51 [1, 2] : vector<1x16x1xf32> to vector<1xf32>
    %117 = vector.shape_cast %116 : vector<1xf32> to vector<1x1x1xf32>
    %118 = vector.extract %117[0, 0, 0] : f32 from vector<1x1x1xf32>
    %119 = vector.broadcast %118 : f32 to vector<16x1xf32>
    %120 = arith.subf %114, %119 : vector<16x1xf32>
    %121 = math.exp %120 : vector<16x1xf32>
    %cst_52 = arith.constant dense<0.000000e+00> : vector<2x1xf32>
    %122 = tpu.matmul %7, %121, %cst_52 {dimension_numbers = #tpu.dot_dimension_numbers<[1], [0], [0], [1], [0, 0, 1, 1], [], []>} : vector<2x16xf32>, vector<16x1xf32>, vector<2x1xf32> -> vector<2x1xf32>
    %123 = vector.broadcast %121 : vector<16x1xf32> to vector<16x128xf32>
    %124 = arith.mulf %123, %27 : vector<16x128xf32>
    %cst_53 = arith.constant dense<0.000000e+00> : vector<2x128xf32>
    %125 = tpu.matmul %7, %124, %cst_53 {dimension_numbers = #tpu.dot_dimension_numbers<[1], [0], [0], [1], [0, 0, 1, 1], [], []>} : vector<2x16xf32>, vector<16x128xf32>, vector<2x128xf32> -> vector<2x128xf32>
    %126 = tpu.reciprocal %122 {approx = true} : vector<2x1xf32> -> vector<2x1xf32>
    %127 = vector.broadcast %126 : vector<2x1xf32> to vector<2x128xf32>
    %128 = arith.mulf %125, %127 : vector<2x128xf32>
    %129 = tpu.concatenate %110, %128 in 1 : vector<2x128xf32>, vector<2x128xf32> -> vector<2x256xf32>
    %c0_54 = arith.constant 0 : index
    %c0_55 = arith.constant 0 : index
    %130 = vector.load %arg12[%c0_54, %c0_55] : memref<256x128xf32, #tpu.memory_space<vmem>>, vector<256x128xf32>
    %cst_56 = arith.constant dense<0.000000e+00> : vector<2x128xf32>
    %131 = tpu.matmul %129, %130, %cst_56 {dimension_numbers = #tpu.dot_dimension_numbers<[1], [0], [0], [1], [0, 0, 1, 1], [], []>} : vector<2x256xf32>, vector<256x128xf32>, vector<2x128xf32> -> vector<2x128xf32>
    %c0_57 = arith.constant 0 : index
    %c0_58 = arith.constant 0 : index
    %132 = vector.load %arg13[%c0_57, %c0_58] : memref<1x128xf32, #tpu.memory_space<vmem>>, vector<1x128xf32>
    %133 = vector.broadcast %132 : vector<1x128xf32> to vector<2x128xf32>
    %134 = arith.addf %131, %133 : vector<2x128xf32>
    %135 = arith.addf %134, %28 : vector<2x128xf32>
    %c0_59 = arith.constant 0 : index
    %c0_60 = arith.constant 0 : index
    %c0_61 = arith.constant 0 : index
    %136 = vector.load %arg14[%c0_59, %c0_60, %c0_61] : memref<1x2x128xf32, #tpu.memory_space<vmem>>, vector<1x2x128xf32>
    %137 = vector.shape_cast %136 : vector<1x2x128xf32> to vector<2x128xf32>
    %138 = vector.shape_cast %135 : vector<2x128xf32> to vector<1x2x128xf32>
    tpu.vector_store %arg14[%c0_59, %c0_60, %c0_61], %138 {strides = array<i32>} : memref<1x2x128xf32, #tpu.memory_space<vmem>>, vector<1x2x128xf32>,
    return
  }
  func.func @transform_0(%arg0: i32) -> (i32, i32, i32) {
    %c0_i32 = arith.constant 0 : i32
    %c0_i32_0 = arith.constant 0 : i32
    %c0_i32_1 = arith.constant 0 : i32
    return %arg0, %c0_i32, %c0_i32_0 : i32, i32, i32
  }
  func.func @transform_1(%arg0: i32) -> (i32, i32, i32) {
    %c0_i32 = arith.constant 0 : i32
    %c0_i32_0 = arith.constant 0 : i32
    %c0_i32_1 = arith.constant 0 : i32
    return %arg0, %c0_i32, %c0_i32_0 : i32, i32, i32
  }
  func.func @transform_2(%arg0: i32) -> (i32, i32, i32) {
    %c0_i32 = arith.constant 0 : i32
    %c0_i32_0 = arith.constant 0 : i32
    %c0_i32_1 = arith.constant 0 : i32
    return %arg0, %c0_i32, %c0_i32_0 : i32, i32, i32
  }
  func.func @transform_3(%arg0: i32) -> (i32, i32, i32) {
    %c0_i32 = arith.constant 0 : i32
    %c0_i32_0 = arith.constant 0 : i32
    %c0_i32_1 = arith.constant 0 : i32
    return %arg0, %c0_i32, %c0_i32_0 : i32, i32, i32
  }
  func.func @transform_4(%arg0: i32) -> (i32, i32, i32) {
    %c0_i32 = arith.constant 0 : i32
    %c0_i32_0 = arith.constant 0 : i32
    %c0_i32_1 = arith.constant 0 : i32
    return %arg0, %c0_i32, %c0_i32_0 : i32, i32, i32
  }
  func.func @transform_5(%arg0: i32) -> (i32, i32) {
    %c0_i32 = arith.constant 0 : i32
    %c0_i32_0 = arith.constant 0 : i32
    %c0_i32_1 = arith.constant 0 : i32
    return %c0_i32, %c0_i32_0 : i32, i32
  }
  func.func @transform_6(%arg0: i32) -> (i32, i32) {
    %c0_i32 = arith.constant 0 : i32
    %c0_i32_0 = arith.constant 0 : i32
    %c0_i32_1 = arith.constant 0 : i32
    return %c0_i32, %c0_i32_0 : i32, i32
  }
  func.func @transform_7(%arg0: i32) -> (i32, i32) {
    %c0_i32 = arith.constant 0 : i32
    %c0_i32_0 = arith.constant 0 : i32
    %c0_i32_1 = arith.constant 0 : i32
    return %c0_i32, %c0_i32_0 : i32, i32
  }
  func.func @transform_8(%arg0: i32) -> (i32, i32) {
    %c0_i32 = arith.constant 0 : i32
    %c0_i32_0 = arith.constant 0 : i32
    %c0_i32_1 = arith.constant 0 : i32
    return %c0_i32, %c0_i32_0 : i32, i32
  }
  func.func @transform_9(%arg0: i32) -> (i32, i32) {
    %c0_i32 = arith.constant 0 : i32
    %c0_i32_0 = arith.constant 0 : i32
    %c0_i32_1 = arith.constant 0 : i32
    return %c0_i32, %c0_i32_0 : i32, i32
  }
  func.func @transform_10(%arg0: i32) -> (i32, i32) {
    %c0_i32 = arith.constant 0 : i32
    %c0_i32_0 = arith.constant 0 : i32
    %c0_i32_1 = arith.constant 0 : i32
    return %c0_i32, %c0_i32_0 : i32, i32
  }
  func.func @transform_11(%arg0: i32) -> (i32, i32) {
    %c0_i32 = arith.constant 0 : i32
    %c0_i32_0 = arith.constant 0 : i32
    %c0_i32_1 = arith.constant 0 : i32
    return %c0_i32, %c0_i32_0 : i32, i32
  }
  func.func @transform_12(%arg0: i32) -> (i32, i32) {
    %c0_i32 = arith.constant 0 : i32
    %c0_i32_0 = arith.constant 0 : i32
    %c0_i32_1 = arith.constant 0 : i32
    return %c0_i32, %c0_i32_0 : i32, i32
  }
  func.func @transform_13(%arg0: i32) -> (i32, i32, i32) {
    %c0_i32 = arith.constant 0 : i32
    %c0_i32_0 = arith.constant 0 : i32
    %c0_i32_1 = arith.constant 0 : i32
    return %arg0, %c0_i32, %c0_i32_0 : i32, i32, i32
  }
}

</mosaic_0001>

<bundles_post_ra>
// kernel: tpu_custom_call.1
= control target key start
LH: loop header
LB: loop body
LE: loop exit
PB: predicated region body
PF: predicated region fallthrough
CT: control target
= control target key end

     0   :  { %s4315_s0 = inlined_call_operand.hbm [shape: f32[4,16,16], index: 0, kind: input, shape index: {}]   ;;  %s4316_s1 = inlined_call_operand.hbm [shape: f32[4,16,16], index: 1, kind: input, shape index: {}]   ;;  %s4317_s2 = inlined_call_operand.vmem [shape: f32[4,16,1], index: 2, kind: input, shape index: {}]   ;;  %s4318_s3 = inlined_call_operand.vmem [shape: f32[4,2,16], index: 3, kind: input, shape index: {}]   ;;  %s4319_s4 = inlined_call_operand.vmem [shape: f32[4,16,2], index: 4, kind: input, shape index: {}]   ;;  %s4320_s5 = inlined_call_operand.vmem [shape: f32[16,128], index: 5, kind: input, shape index: {}]   ;;  %s4321_s6 = inlined_call_operand.hbm [shape: f32[1,128], index: 6, kind: input, shape index: {}]   ;;  %s4322_s7 = inlined_call_operand.vmem [shape: f32[128,128], index: 7, kind: input, shape index: {}]   ;;  %s4323_s8 = inlined_call_operand.hbm [shape: f32[1,128], index: 8, kind: input, shape index: {}]   ;;  %s4324_s9 = inlined_call_operand.hbm [shape: f32[384,512], index: 9, kind: input, shape index: {}]   ;;  %s4325_s10 = inlined_call_operand.vmem [shape: f32[1,512], index: 10, kind: input, shape index: {}]   ;;  %s4326_s11 = inlined_call_operand.hbm [shape: f32[256,128], index: 11, kind: input, shape index: {}]   ;;  %s4327_s12 = inlined_call_operand.vmem [shape: f32[1,128], index: 12, kind: input, shape index: {}]   ;;  %s4328_s13 = inlined_call_operand.hbm [shape: f32[4,2,128], index: 13, kind: output, shape index: {}]  }
   0x1   :  { %4404 = sst [smem:[#allocation85_spill]] %s4315_s0 }
   0x2   :  { %4405 = sst [smem:[#allocation86_spill]] %s4321_s6 }
   0x3   :  { %4406 = sst [smem:[#allocation87_spill]] %s4323_s8 }
   0x4   :  { %4407 = sst [smem:[#allocation88_spill]] %s4324_s9 }
   0x5   :  { %4408 = sst [smem:[#allocation89_spill]] %s4326_s11 }
   0x6   :  { %18 = vsyncpa [#allocation3], 0 }
   0x7   :  { %20 = vsyncpa [#allocation3 + $0x1], 0 }
   0x8   :  { %21 = vsyncpa [#allocation6], 0 }
   0x9   :  { %23 = vsyncpa [#allocation6 + $0x1], 0 }
   0xa   :  { %24 = vsyncpa [#allocation9], 0 }
   0xb   :  { %25 = vsyncpa [#allocation12], 0 }
   0xc   :  { %26 = vsyncpa [#allocation4], 0 }
   0xd   :  { %28 = vsyncpa [#allocation4 + $0x1], 0  ;;  %s3483_s25 = smov 0   ;;  %s3485_s26 = smov 0  }
   0xe   :  { %s3487_s27 = smov 0   ;;  %s3489_s28 = smov 0  }
   0xf LB: > { %4409 = sst [smem:[#allocation20_spill]] %s3385_s25  ;;  %s3504_s29 = sadd.s32 4294967295, %s3397_s28   ;;  %s3397_s28 = sphi %s3489_s28, %s4560_s28   ;;  %s3393_s27 = sphi %s3487_s27, %s4565_s27   ;;  %s3389_s26 = sphi %s3485_s26, %s4564_s26   ;;  %s3385_s25 = sphi %s3483_s25, %s4563_s25  }
  0x10   : > { %4410 = sst [smem:[#allocation21_spill]] %s3393_s27  ;;  %s2670_s30 = sadd.s32 4294967294, %s3397_s28  }
  0x11   : > { %p54_p0 = scmp.ne.s32.totalorder %s3389_s26, %s3385_s25  ;;  %p4329_p1 = scmp.eq.s32.totalorder %s3504_s29, 0 }
  0x12   : > { %p356_p3 = scmp.eq.s32.totalorder %s2670_s30, 3  ;;  %p2671_p5 = scmp.ge.s32.totalorder %s3397_s28, 1 }
  0x13   : > { %p3513_p4 = por %p4329_p1, %p54_p0  ;;  %p363_p7 = scmp.lt.s32.totalorder %s3397_s28, 5 }
  0x14   : > { %p3518_p6 = por %p356_p3, %p54_p0  ;;  %s3399_s17 = smov [#allocation7]  }
  0x15   : > { %s4411_s14 = scalar_select %p3513_p4, 1, 0 }
  0x16   : > { %s4412_s15 = scalar_select %p3518_p6, 1, 0 }
  0x17   : > { %p3523_p8 = pnand %p2671_p5, %p363_p7  ;;  %s379_s18 = sshll.u32 %s3399_s17, 4  ;;  %s380_s18 = int_to_ptr.vmem [resolvable:$true] %s379_s18 }
  0x18   : > { %4413 = sst [smem:[#allocation22_spill]] %s4412_s15  ;;  %s3400_s19 = smov [#allocation8]  }
  0x19   : > { %p2937_p9 = pneg %p3523_p8  ;;  %s393_s20 = sshll.u32 %s3400_s19, 4  ;;  %s394_s20 = int_to_ptr.vmem [resolvable:$true] %s393_s20 }
  0x1a   : > { %s3401_s22 = smov [#allocation10]   ;;  %s3168_s24 = scalar_lea.vmem %s380_s18, 16 }
  0x1b   : > { %p3531_p10 = pnand %p2937_p9, %p4329_p1  ;;  %s403_s23 = sshll.u32 %s3401_s22, 4  ;;  %s3535_s23 = int_to_ptr.vmem [resolvable:$true] %s403_s23 }
  0x1c   : > { %p3169_p12 = scmp.ne.s32.totalorder %s380_s18, %s3168_s24  ;;  %s3175_s30 = scalar_lea.vmem %s380_s18, 32 }
  0x1d   : > { %p3159_p11 = pneg %p3531_p10  ;;  %p3176_p3 = scmp.lt.s32.totalorder %s380_s18, %s380_s18 }
  0x1e   : > { %p3177_p5 = scmp.lt.s32.totalorder %s3175_s30, %s3168_s24 }
  0x1f   : > { %p3171_p13 = pnand %p3169_p12, %p3159_p11 }
  0x20   : > { %p3178_p7 = por %p3177_p5, %p3176_p3 }
  0x21   : > { %p3172_p0 = pneg %p3171_p13 }
  0x23   : > { %p3179_p9 = pnand %p3178_p7, %p3172_p0 }
  0x25   : > { %3182 = shalt.err (!%p3179_p9)
}
  0x26   : > { %s4416_s6 = sld [smem:[#allocation86_spill]]  ;;  %s3194_s22 = scalar_lea.vmem %s394_s20, 16 }
  0x27   : > { %p3195_p1 = scmp.ne.s32.totalorder %s394_s20, %s3194_s22  ;;  %s3201_s15 = scalar_lea.vmem %s394_s20, 32 }
  0x28   : > { %p3202_p13 = scmp.lt.s32.totalorder %s394_s20, %s394_s20  ;;  %p3203_p6 = scmp.lt.s32.totalorder %s3201_s15, %s3194_s22 }
  0x29   : > { %p3197_p2 = pnand %p3195_p1, %p3159_p11 }
  0x2a   : > { %p3204_p4 = por %p3203_p6, %p3202_p13 }
  0x2b   : > { %p3198_p12 = pneg %p3197_p2 }
  0x2c   : > { %2940 = dma.hbm_to_vmem [thread:$0]  (!%p3531_p10), %s4416_s6, 16, %s380_s18, [#allocation6]  }
  0x2d   : > { %p3205_p3 = pnand %p3204_p4, %p3198_p12 }
  0x2f   : > { %3208 = shalt.err (!%p3205_p3)
}
  0x30   : > { %s4417_s8 = sld [smem:[#allocation87_spill]]  ;;  %s3220_s18 = scalar_lea.vmem %s3535_s23, 24576 }
  0x31   : > { %p3221_p0 = scmp.ne.s32.totalorder %s3535_s23, %s3220_s18  ;;  %p3228_p6 = scmp.lt.s32.totalorder %s3535_s23, %s3535_s23 }
  0x32   : > { %p3229_p4 = scmp.lt.s32.totalorder %s3220_s18, %s3220_s18 }
  0x33   : > { %p3223_p1 = pnand %p3221_p0, %p3159_p11 }
  0x34   : > { %p3230_p5 = por %p3229_p4, %p3228_p6 }
  0x35   : > { %p3224_p2 = pneg %p3223_p1 }
  0x36   : > { %2943 = dma.hbm_to_vmem [thread:$0]  (!%p3531_p10), %s4417_s8, 16, %s394_s20, [#allocation9]  }
  0x37   : > { %p3231_p7 = pnand %p3230_p5, %p3224_p2 }
  0x39   : > { %3234 = shalt.err (!%p3231_p7)
}
  0x3a   : > { %s3402_s15 = smov 512   ;;  %s3403_s17 = smov 32  }
  0x3b   : > { %s4418_s9 = sld [smem:[#allocation88_spill]]  ;;  %s3404_s22 = smov [#allocation11]  }
  0x3c   : > { %s419_s24 = sshll.u32 %s3404_s22, 4  ;;  %s420_s24 = int_to_ptr.vmem [resolvable:$true] %s419_s24 }
  0x3d   : > { %s3246_s30 = scalar_lea.vmem %s420_s24, 4096  ;;  %p3254_p3 = scmp.lt.s32.totalorder %s420_s24, %s420_s24 }
  0x3e   : > { %p3247_p9 = scmp.ne.s32.totalorder %s420_s24, %s3246_s30  ;;  %p3255_p0 = scmp.lt.s32.totalorder %s3246_s30, %s3246_s30 }
  0x40   : > { %p3249_p12 = pnand %p3247_p9, %p3159_p11  ;;  %p3256_p1 = por %p3255_p0, %p3254_p3 }
  0x41   : > { %2946 = dma.hbm_to_vmem [thread:$0]  (!%p3531_p10), %s4418_s9, 24576, %s3535_s23, [#allocation9], %s3402_s15, %s3402_s15, %s3403_s17  }
  0x42   : > { %p3250_p13 = pneg %p3249_p12 }
  0x44   : > { %p3257_p2 = pnand %p3256_p1, %p3250_p13 }
  0x46   : > { %3260 = shalt.err (!%p3257_p2)
}
  0x47   : > { %s4332_s18 = smov 128   ;;  %s4334_s23 = smov 8  }
  0x48   : > { %s4419_s11 = sld [smem:[#allocation89_spill]]  ;;  %s3580_s19 = sadd.s32 1, %s3397_s28  }
  0x49   : > { %4420 = sst [smem:[#allocation23_spill]] %s3580_s19  ;;  %s38_s20 = ssub.s32 %s3397_s28, %s3580_s19 }
  0x4a   : > { %p39_p11 = scmp.eq.s32.totalorder %s38_s20, 0  ;;  %s41_s22 = sadd.s32 1, %s3393_s27 }
  0x4b   : > { %p48_p6 = scmp.ne.s32.totalorder %s3393_s27, %s3389_s26  ;;  %p49_p4 = scmp.eq.s32.totalorder %s3397_s28, 0 }
  0x4c   : > { %s3589_s30 = scalar_select %p39_p11, %s3393_s27, %s41_s22  }
  0x4d   : > { %p50_p5 = por %p49_p4, %p48_p6  ;;  %p4422_p7 = scmp.eq.s32.totalorder %s3504_s29, 3 }
  0x4e   : > { %2949 = dma.hbm_to_vmem [thread:$0]  (!%p3531_p10), %s4419_s11, 4096, %s420_s24, [#allocation12], %s4332_s18, %s4332_s18, %s4334_s23  }
  0x4f   : > { %4421 = sst [smem:[#allocation24_spill]] %s3589_s30  ;;  %p3593_p9 = por %p4422_p7, %p48_p6 }
  0x50   : > { %p2965_p12 = scmp.lt.s32.totalorder %s3397_s28, 4  ;;  %s436_s6 = sand.u32 1, %s3393_s27  }
  0x51   : > { %s4423_s21 = scalar_select %p3593_p9, 1, 0 }
  0x52   : > { %s2677_s15 = sshll.u32 %s436_s6, 4  ;;  %s2720_s24 = sshll.u32 %s3397_s28, 8 }
  0x53   : > { %s4424_s0 = sld [smem:[#allocation85_spill]]  ;;  %s440_s20 = scalar_lea.vmem [#allocation2], %s2677_s15 }
  0x54   : > { %s447_s22 = sshll.u32 %s440_s20, 4  ;;  %p3607_p10 = pnand %p2965_p12, %p50_p5  ;;  %s3605_s22 = int_to_ptr.vmem [resolvable:$true] %s447_s22 }
  0x55   : > { %s3614_s30 = scalar_lea.hbm %s4316_s1, %s2720_s24  ;;  %s461_s18 = scalar_lea.vmem [#allocation5], %s2677_s15 }
  0x56   : > { %s3616_s17 = sshll.u32 %s461_s18, 4  ;;  %s3618_s27 = scalar_lea.sflag [#allocation3], %s436_s6  ;;  %s3649_s17 = int_to_ptr.vmem [resolvable:$true] %s3616_s17 }
  0x57   : > { %p3263_p3 = pneg %p3607_p10 }
  0x59   : > { %s3603_s23 = scalar_lea.hbm %s4424_s0, %s2720_s24  ;;  %s3266_s9 = scalar_lea.hbm %s4424_s0, 1024 }
  0x5a   : > { %s3261_s19 = scalar_lea.hbm %s3603_s23, 256  ;;  %p3267_p2 = scmp.lt.s32.totalorder %s3603_s23, %s4424_s0 }
  0x5b   : > { %p3262_p13 = scmp.ne.s32.totalorder %s3603_s23, %s3261_s19  ;;  %p3268_p11 = scmp.lt.s32.totalorder %s3266_s9, %s3261_s19 }
  0x5d   : > { %p3264_p0 = pnand %p3263_p3, %p3262_p13  ;;  %p3269_p6 = por %p3268_p11, %p3267_p2 }
  0x5f   : > { %p3265_p1 = pneg %p3264_p0 }
  0x61   : > { %p3270_p4 = pnand %p3269_p6, %p3265_p1 }
  0x63   : > { %3273 = shalt.err (!%p3270_p4)
}
  0x64   : > { %s3274_s6 = scalar_lea.vmem %s3605_s22, 256  ;;  %s3407_s25 = smov [#allocation2]  }
  0x65   : > { %p3275_p5 = scmp.ne.s32.totalorder %s3605_s22, %s3274_s6  ;;  %s3279_s15 = sshll.u32 %s3407_s25, 4  ;;  %s3280_s15 = int_to_ptr.vmem [resolvable:$false] %s3279_s15 }
  0x66   : > { %s3281_s18 = scalar_lea.vmem %s3280_s15, 512  ;;  %p3282_p13 = scmp.lt.s32.totalorder %s3605_s22, %s3280_s15 }
  0x67   : > { %p3277_p7 = pnand %p3275_p5, %p3263_p3  ;;  %p3283_p0 = scmp.lt.s32.totalorder %s3281_s18, %s3274_s6 }
  0x69   : > { %p3278_p12 = pneg %p3277_p7  ;;  %p3284_p9 = por %p3283_p0, %p3282_p13 }
  0x6b   : > { %p3285_p2 = pnand %p3284_p9, %p3278_p12 }
  0x6d   : > { %3288 = shalt.err (!%p3285_p2)
}
  0x6e   : > { %s4426_s19 = smov 8   ;;  %s4427_s20 = smov 128  }
  0x6f   : > { %2953 = dma.hbm_to_vmem [thread:$0]  (!%p3607_p10), %s3603_s23, 256, %s3605_s22, %s3618_s27, %s4427_s20, %s4427_s20, %s4426_s19  }
  0x70   : > { %s457_s9 = sand.u32 1, %s3397_s28   ;;  %s3289_s24 = scalar_lea.hbm %s3614_s30, 256 }
  0x71   : > { %s458_s11 = scalar_lea.sflag [#allocation6], %s457_s9  ;;  %p3290_p9 = scmp.ne.s32.totalorder %s3614_s30, %s3289_s24 }
  0x72   : > { %s3294_s15 = scalar_lea.hbm %s4316_s1, 1024  ;;  %p3295_p6 = scmp.lt.s32.totalorder %s3614_s30, %s4316_s1 }
  0x73   : > { %p3292_p1 = pnand %p3290_p9, %p3263_p3  ;;  %p3296_p4 = scmp.lt.s32.totalorder %s3294_s15, %s3289_s24 }
  0x75   : > { %p3293_p11 = pneg %p3292_p1  ;;  %p3297_p5 = por %p3296_p4, %p3295_p6 }
  0x77   : > { %p3298_p7 = pnand %p3297_p5, %p3293_p11 }
  0x79   : > { %3301 = shalt.err (!%p3298_p7)
}
  0x7a   : > { %s3302_s27 = scalar_lea.vmem %s3649_s17, 256  ;;  %s3408_s23 = smov [#allocation5]  }
  0x7b   : > { %p3303_p12 = scmp.ne.s32.totalorder %s3649_s17, %s3302_s27  ;;  %s3307_s22 = sshll.u32 %s3408_s23, 4  ;;  %s3308_s22 = int_to_ptr.vmem [resolvable:$false] %s3307_s22 }
  0x7c   : > { %s3309_s9 = scalar_lea.vmem %s3308_s22, 512  ;;  %p3310_p2 = scmp.lt.s32.totalorder %s3649_s17, %s3308_s22 }
  0x7d   : > { %p3305_p13 = pnand %p3303_p12, %p3263_p3  ;;  %p3311_p9 = scmp.lt.s32.totalorder %s3309_s9, %s3302_s27 }
  0x7f   : > { %p3306_p0 = pneg %p3305_p13  ;;  %p3312_p1 = por %p3311_p9, %p3310_p2 }
  0x81   : > { %p3313_p6 = pnand %p3312_p1, %p3306_p0 }
  0x83   : > { %3316 = shalt.err (!%p3313_p6)
}
  0x84   : > { %2956 = dma.hbm_to_vmem [thread:$0]  (!%p3607_p10), %s3614_s30, 256, %s3649_s17, %s458_s11, %s4427_s20, %s4427_s20, %s4426_s19  }
  0x85   : > { %503 = sbr.rel (%p3523_p8) target bundleno = 3285 (0xcd5), region = 72 }
  0x8a   : > { %s3680_s0 = sand.u32 1, %s3389_s26   ;;  %p4428_p3 = scmp.ne.s32.totalorder %s4411_s14, 0 }
  0x8b   : > { %s2684_s24 = sshll.u32 %s3680_s0, 4  ;;  %s506_s6 = scalar_lea.sflag [#allocation3], %s3680_s0 }
  0x8c   : > { %s509_s25 = scalar_lea.vmem [#allocation2], %s2684_s24 }
  0x8d   : > { %3360 = dma.done.wait (%p4428_p3), %s506_s6, 256  }
  0x8e   : > { %3362 = vsyncadd (%p4428_p3), %s506_s6, 4294967040  ;;  %s514_s8 = sand.u32 1, %s3504_s29   ;;  %s518_s16 = scalar_lea.vmem [#allocation5], %s2684_s24 }
  0x8f   : > { %s515_s30 = scalar_lea.sflag [#allocation6], %s514_s8 }
  0x90   : > { %3364 = dma.done.wait (%p4428_p3), %s515_s30, 256  }
  0x91   : > { %3366 = vsyncadd (%p4428_p3), %s515_s30, 4294967040  ;;  %p4429_p8 = scmp.eq.s32.totalorder %s3504_s29, 0 }
  0x93   : > { %3368 = dma.done.wait (%p4429_p8), [#allocation6], 16   ;;  %p4430_p10 = pmov %p4429_p8 }
  0x94   : > { %p4431_p11 = pmov %p4429_p8 }
  0x95   : > { %3370 = vsyncadd (%p4430_p10), [#allocation6], 4294967280 }
  0x96   : > { %3372 = dma.done.wait (%p4431_p11), [#allocation9], 24592   ;;  %p4432_p4 = pmov %p4429_p8 }
  0x98   : > { %3374 = vsyncadd (%p4432_p4), [#allocation9], 4294942704  ;;  %p4433_p5 = pmov %p4432_p4 }
  0x99   : > { %p4434_p7 = pmov %p4432_p4 }
  0x9a   : > { %3376 = dma.done.wait (%p4433_p5), [#allocation12], 4096  }
  0x9b   : > { %3378 = vsyncadd (%p4434_p7), [#allocation12], 4294963200  ;;  %vm619_vm0 = vcmask 130048   ;;  %v611_v0 = vld [vmem:[%s509_s25 + $0x8] sm:$0xff]  ;;  %v610_v1 = vld [vmem:[%s509_s25] sm:$0xff]  ;;  %p596_p12 = scmp.lt.s32.totalorder %s3504_s29, 3 }
  0x9c   : > { %v612_v2 = vld [vmem:[%s518_s16] sm:$0xff]  ;;  %2810 = vmatprep.subr.mxu1 %v611_v0  ;;  %v613_v3 = vld [vmem:[%s518_s16 + $0x8] sm:$0xff]  ;;  %v3409_v34 = vmov 0   ;;  %vm3411_vm1 = vmmov 0   ;;  %vm1652_vm2 = vcmask 15360   ;;  %s2690_s17 = sshll.u32 %s3680_s0, 1 }
  0x9d   : > { %2814 = vmatprep.mubr.msk.f32.mxu1 %vm619_vm0, %v612_v2  ;;  %2811 = vmatpush3.msra.mxu1 %v611_v0  ;;  %v702_v4 = vld [vmem:[%s4320_s5 + $0x8] sm:$0xff]  ;;  %v701_v5 = vld [vmem:[%s4320_s5] sm:$0xff]  ;;  %v883_v15 = vld [vmem:[%s4322_s7 + $0x78] sm:$0xff]  ;;  %s3767_s19 = scalar_select %p596_p12, %s3504_s29, 3 }
  0x9e   : > { %2812 = vmatprep.subr.mxu1 %v610_v1  ;;  %v2698_v8 = vld [vmem:[#allocation7] ss:$0 sm:$0xff]  ;;  %v882_v16 = vld [vmem:[%s4322_s7 + $0x70] sm:$0xff]  ;;  %v881_v17 = vld [vmem:[%s4322_s7 + $0x68] sm:$0xff]  ;;  %3014 = vset.pattern.permute.xlu0 %v3409_v34  ;;  %s2717_s11 = sshll.u32 %s3504_s29, 5  ;;  %s595_s15 = scalar_lea.vmem [#allocation13], %s2690_s17 }
  0x9f   : > { %2813 = vmatpush3.msra.mxu1 %v610_v1  ;;  %v880_v18 = vld [vmem:[%s4322_s7 + $0x60] sm:$0xff]  ;;  %v879_v19 = vld [vmem:[%s4322_s7 + $0x58] sm:$0xff]  ;;  %v878_v20 = vld [vmem:[%s4322_s7 + $0x50] sm:$0xff]  ;;  %3015 = vset.pattern.permute.xlu1 %v3409_v34  ;;  %s2722_s20 = sshll.u32 %s3767_s19, 4  ;;  %s2693_s27 = sshll.u32 %s3767_s19, 1 }
  0xa0   : > { %2815 = vmatmul.mubr.msk.f32.vlgmr.msra.gmra.mxu1 %vm619_vm0, %v613_v3  ;;  %2817 = vmatprep.subr.mxu1 %v702_v4  ;;  %v877_v21 = vld [vmem:[%s4322_s7 + $0x48] sm:$0xff]  ;;  %v876_v22 = vld [vmem:[%s4322_s7 + $0x40] sm:$0xff]  ;;  %v875_v23 = vld [vmem:[%s4322_s7 + $0x38] sm:$0xff]  ;;  %s600_s18 = scalar_lea.vmem %s4317_s2, %s2722_s20  ;;  %s3789_s9 = scalar_lea.vmem %s4318_s3, %s2693_s27 }
  0xa1   : > { %2818 = vmatpush3.msra.mxu1 %v702_v4  ;;  %v874_v24 = vld [vmem:[%s4322_s7 + $0x30] sm:$0xff]  ;;  %v873_v25 = vld [vmem:[%s4322_s7 + $0x28] sm:$0xff]  ;;  %v872_v26 = vld [vmem:[%s4322_s7 + $0x20] sm:$0xff]  ;;  %s609_s30 = scalar_lea.vmem %s4319_s4, %s2722_s20  ;;  %s2501_s22 = scalar_lea.hbm %s4328_s13, %s2717_s11 }
  0xa2   : > { %2819 = vmatprep.subr.mxu1 %v701_v5  ;;  %v871_v27 = vld [vmem:[%s4322_s7 + $0x18] sm:$0xff]  ;;  %v870_v28 = vld [vmem:[%s4322_s7 + $0x10] sm:$0xff]  ;;  %v869_v29 = vld [vmem:[%s4322_s7 + $0x8] sm:$0xff]  ;;  %p4556_p0 = scmp.ne.s32.totalorder %s4423_s21, 0  ;;  %s3412_s6 = smov [#allocation13]  }
  0xa3   : > { %2820 = vmatpush3.msra.mxu1 %v701_v5  ;;  %v868_v30 = vld [vmem:[%s4322_s7] sm:$0xff]  ;;  %v1114_v31 = vld [vmem:[#allocation10 + $0x1e8] sm:$0xff]  ;;  %s3321_s25 = sshll.u32 %s3412_s6, 4  ;;  %s3322_s25 = int_to_ptr.vmem [resolvable:$false] %s3321_s25 }
  0xa4   : > { %v1113_v32 = vld [vmem:[#allocation10 + $0x1e0] sm:$0xff]  ;;  %v1110_v33 = vld [vmem:[#allocation10 + $0x1c8] sm:$0xff]  ;;  %1267 = vmatprep.subr.mxu0 %v1114_v31  ;;  %s3323_s29 = scalar_lea.vmem %s3322_s25, 64 }
  0xa5   : > { %v1109_v35 = vld [vmem:[#allocation10 + $0x1c0] sm:$0xff]  ;;  %1268 = vmatpush1.msra.mxu0 %v1113_v32  ;;  %v1106_v36 = vld [vmem:[#allocation10 + $0x1a8] sm:$0xff] }
  0xa6   : > { %1269 = vmatprep.subr.mxu0 %v1110_v33  ;;  %v1105_v37 = vld [vmem:[#allocation10 + $0x1a0] sm:$0xff]  ;;  %v1102_v38 = vld [vmem:[#allocation10 + $0x188] sm:$0xff] }
  0xa7   : > { %1270 = vmatpush1.msra.mxu0 %v1109_v35  ;;  %v1101_v39 = vld [vmem:[#allocation10 + $0x180] sm:$0xff]  ;;  %v1098_v41 = vld [vmem:[#allocation10 + $0x168] sm:$0xff] }
  0xa8   : > { %1271 = vmatprep.subr.mxu0 %v1106_v36  ;;  %v615_v40 = vld [vmem:[%s600_s18 + $0x8] sm:$0xff]  ;;  %v614_v43 = vld [vmem:[%s600_s18] sm:$0xff]  ;;  %s2503_s18 = sshll.u32 %s595_s15, 4  ;;  %s2504_s18 = int_to_ptr.vmem [resolvable:$true] %s2503_s18 }
  0xa9   : > { %1272 = vmatpush1.msra.mxu0 %v1105_v37  ;;  %975 = vperm.xlu0 %3014, %v615_v40   ;;  %v1097_v42 = vld [vmem:[#allocation10 + $0x160] sm:$0xff]  ;;  %v1094_v44 = vld [vmem:[#allocation10 + $0x148] sm:$0xff]  ;;  %v1244_v37 = vld [vmem:[#allocation10 + $0x5f8] sm:$0xff]  ;;  %s3317_s24 = scalar_lea.vmem %s2504_s18, 32  ;;  %p3324_p1 = scmp.lt.s32.totalorder %s2504_s18, %s3322_s25 }
  0xaa   : > { %1273 = vmatprep.subr.mxu0 %v1102_v38  ;;  %v1093_v45 = vld [vmem:[#allocation10 + $0x140] sm:$0xff]  ;;  %v1090_v46 = vld [vmem:[#allocation10 + $0x128] sm:$0xff]  ;;  %v1243_v38 = vld [vmem:[#allocation10 + $0x5f0] sm:$0xff]  ;;  %p3318_p13 = scmp.ne.s32.totalorder %s2504_s18, %s3317_s24  ;;  %p3325_p6 = scmp.lt.s32.totalorder %s3323_s29, %s3317_s24 }
  0xab   : > { %1274 = vmatpush1.msra.mxu0 %v1101_v39  ;;  %v1089_v47 = vld [vmem:[#allocation10 + $0x120] sm:$0xff]  ;;  %v1086_v48 = vld [vmem:[#allocation10 + $0x108] sm:$0xff]  ;;  %v1240_v39 = vld [vmem:[#allocation10 + $0x5d8] sm:$0xff] }
  0xac   : > { %1275 = vmatprep.subr.mxu0 %v1098_v41  ;;  %v1085_v49 = vld [vmem:[#allocation10 + $0x100] sm:$0xff]  ;;  %v1082_v50 = vld [vmem:[#allocation10 + $0xe8] sm:$0xff]  ;;  %v1239_v40 = vld [vmem:[#allocation10 + $0x5d0] sm:$0xff]  ;;  %p3319_p2 = pnand %p3318_p13, %p4556_p0  ;;  %p3326_p3 = por %p3325_p6, %p3324_p1 }
  0xad   : > { %1276 = vmatpush1.msra.mxu0 %v1097_v42  ;;  %970 = vperm.xlu0 %3014, %v614_v43   ;;  %v1081_v51 = vld [vmem:[#allocation10 + $0xe0] sm:$0xff]  ;;  %v1078_v52 = vld [vmem:[#allocation10 + $0xc8] sm:$0xff]  ;;  %v1236_v41 = vld [vmem:[#allocation10 + $0x5b8] sm:$0xff] }
  0xae   : > { %1277 = vmatprep.subr.mxu0 %v1094_v44  ;;  %v1077_v53 = vld [vmem:[#allocation10 + $0xc0] sm:$0xff]  ;;  %v1074_v54 = vld [vmem:[#allocation10 + $0xa8] sm:$0xff]  ;;  %v1235_v42 = vld [vmem:[#allocation10 + $0x5b0] sm:$0xff]  ;;  %p3320_p9 = pneg %p3319_p2 }
  0xaf   : > { %1278 = vmatpush1.msra.mxu0 %v1093_v45  ;;  %v1073_v55 = vld [vmem:[#allocation10 + $0xa0] sm:$0xff]  ;;  %v1070_v56 = vld [vmem:[#allocation10 + $0x88] sm:$0xff]  ;;  %v1232_v43 = vld [vmem:[#allocation10 + $0x598] sm:$0xff] }
  0xb0   : > { %1279 = vmatprep.subr.mxu0 %v1090_v46  ;;  %v1069_v57 = vld [vmem:[#allocation10 + $0x80] sm:$0xff]  ;;  %v1066_v60 = vld [vmem:[#allocation10 + $0x68] sm:$0xff]  ;;  %v1231_v44 = vld [vmem:[#allocation10 + $0x590] sm:$0xff]  ;;  %p3327_p8 = pnand %p3326_p3, %p3320_p9 }
  0xb1   : > { %1280 = vmatpush1.msra.mxu0 %v1089_v47  ;;  %v1065_v61 = vld [vmem:[#allocation10 + $0x60] sm:$0xff]  ;;  %v1062_v62 = vld [vmem:[#allocation10 + $0x48] sm:$0xff]  ;;  %v1228_v45 = vld [vmem:[#allocation10 + $0x578] sm:$0xff] }
  0xb2   : > { %1281 = vmatprep.subr.mxu0 %v1086_v48  ;;  %v1061_v63 = vld [vmem:[#allocation10 + $0x40] sm:$0xff]  ;;  %v1058_v0 = vld [vmem:[#allocation10 + $0x28] sm:$0xff]  ;;  %v1227_v46 = vld [vmem:[#allocation10 + $0x570] sm:$0xff] }
  0xb3   : > { %1282 = vmatpush1.msra.mxu0 %v1085_v49  ;;  %v1057_v1 = vld [vmem:[#allocation10 + $0x20] sm:$0xff]  ;;  %v1178_v5 = vld [vmem:[#allocation10 + $0x3e8] sm:$0xff]  ;;  %v1224_v47 = vld [vmem:[#allocation10 + $0x558] sm:$0xff] }
  0xb4   : > { %1283 = vmatprep.subr.mxu0 %v1082_v50  ;;  %v1053_v4 = vld [vmem:[#allocation10] sm:$0xff]  ;;  %v1126_v31 = vld [vmem:[#allocation10 + $0x248] sm:$0xff]  ;;  %v1223_v48 = vld [vmem:[#allocation10 + $0x550] sm:$0xff] }
  0xb5   : > { %1284 = vmatpush1.msra.mxu0 %v1081_v51  ;;  %v1125_v32 = vld [vmem:[#allocation10 + $0x240] sm:$0xff]  ;;  %v1122_v33 = vld [vmem:[#allocation10 + $0x228] sm:$0xff]  ;;  %v1220_v49 = vld [vmem:[#allocation10 + $0x538] sm:$0xff] }
  0xb6   : > { %1285 = vmatprep.subr.mxu0 %v1078_v52  ;;  %v1121_v34 = vld [vmem:[#allocation10 + $0x220] sm:$0xff]  ;;  %v1118_v35 = vld [vmem:[#allocation10 + $0x208] sm:$0xff]  ;;  %v1219_v50 = vld [vmem:[#allocation10 + $0x530] sm:$0xff] }
  0xb7   : > { %1286 = vmatpush1.msra.mxu0 %v1077_v53  ;;  %v1117_v36 = vld [vmem:[#allocation10 + $0x200] sm:$0xff]  ;;  %v1216_v51 = vld [vmem:[#allocation10 + $0x518] sm:$0xff]  ;;  %v1215_v52 = vld [vmem:[#allocation10 + $0x510] sm:$0xff] }
  0xb8   : > { %1287 = vmatprep.subr.mxu0 %v1074_v54  ;;  %v1212_v53 = vld [vmem:[#allocation10 + $0x4f8] sm:$0xff]  ;;  %v1211_v54 = vld [vmem:[#allocation10 + $0x4f0] sm:$0xff] }
  0xb9   : > { %1288 = vmatpush1.msra.mxu0 %v1073_v55  ;;  %v1208_v55 = vld [vmem:[#allocation10 + $0x4d8] sm:$0xff] }
  0xba   : > { %1289 = vmatprep.subr.mxu0 %v1070_v56  ;;  %v1207_v56 = vld [vmem:[#allocation10 + $0x4d0] sm:$0xff] }
  0xbb   : > { %1290 = vmatpush1.msra.mxu0 %v1069_v57  ;;  %v1204_v57 = vld [vmem:[#allocation10 + $0x4b8] sm:$0xff] }
  0xbc   : > { %1291 = vmatprep.subr.mxu0 %v1066_v60  ;;  %v1199_v60 = vld [vmem:[#allocation10 + $0x490] sm:$0xff] }
  0xbd   : > { %1292 = vmatpush1.msra.mxu0 %v1065_v61  ;;  %v1196_v61 = vld [vmem:[#allocation10 + $0x478] sm:$0xff] }
  0xbe   : > { %1293 = vmatprep.subr.mxu0 %v1062_v62  ;;  %v1195_v62 = vld [vmem:[#allocation10 + $0x470] sm:$0xff] }
  0xbf   : > { %1294 = vmatpush1.msra.mxu0 %v1061_v63  ;;  %v1192_v63 = vld [vmem:[#allocation10 + $0x458] sm:$0xff] }
  0xc0   : > { %1295 = vmatprep.subr.mxu0 %v1058_v0  ;;  %v1191_v0 = vld [vmem:[#allocation10 + $0x450] sm:$0xff] }
  0xc1   : > { %1296 = vmatpush1.msra.mxu0 %v1057_v1  ;;  %v1188_v1 = vld [vmem:[#allocation10 + $0x438] sm:$0xff] }
 0x160   : > { %v2816_v6 = vpop.f32.mrf.mxu1 }
 0x162   : > { %v692_v7 = vpop.f32.mrf.mxu1 }
 0x163   : > { %2821 = vmatprep.mubr.msk.f32.mxu1 %vm619_vm0, %v692_v7  ;;  %v1174_v7 = vld [vmem:[#allocation10 + $0x3c8] sm:$0xff] }
 0x164   : > { %2822 = vmatmul.mubr.msk.f32.vlgmr.msra.gmra.mxu1 %vm619_vm0, %v2816_v6  ;;  %v1177_v6 = vld [vmem:[#allocation10 + $0x3e0] sm:$0xff] }
 0x165   : > { %2828 = vmatprep.mubr.msk.f32.mxu1 %vm619_vm0, %v612_v2  ;;  %v1054_v2 = vld [vmem:[#allocation10 + $0x8] sm:$0xff] }
 0x166   : > { %1297 = vmatprep.subr.mxu0 %v1054_v2  ;;  %v1187_v2 = vld [vmem:[#allocation10 + $0x430] sm:$0xff] }
 0x167   : > { %1298 = vmatpush1.msra.mxu0 %v1053_v4  ;;  %v1184_v4 = vld [vmem:[#allocation10 + $0x418] sm:$0xff] }
 0x168   : > { %1299 = vmatprep.subr.mxu0 %v1178_v5  ;;  %v1183_v5 = vld [vmem:[#allocation10 + $0x410] sm:$0xff] }
 0x169   : > { %1300 = vmatpush2.msra.mxu0 %v1177_v6  ;;  %v2703_v6 = vld [vmem:[#allocation8] ss:$0 sm:$0xff] }
 0x16a   : > { %1301 = vmatprep.subr.mxu0 %v1174_v7  ;;  %v976_v7 = vpop.permute.xlu0 %975 }
 0x224   : > { %v2823_v9 = vpop.f32.mrf.mxu1 }
 0x225   : > { %v788_v10 = vadd.f32 %v2823_v9, %v2698_v8  ;;  %v1170_v9 = vld [vmem:[#allocation10 + $0x3a8] sm:$0xff] }
 0x226   : > { %v782_v11 = vpop.f32.mrf.mxu1 }
 0x227   : > { %v792_v12 = vmax.f32 %v788_v10, 0.0  ;;  %v783_v13 = vadd.f32 %v2698_v8, %v782_v11  ;;  %v1173_v8 = vld [vmem:[#allocation10 + $0x3c0] sm:$0xff]  ;;  %v1166_v11 = vld [vmem:[#allocation10 + $0x388] sm:$0xff] }
 0x228   : > { %1302 = vmatpush2.msra.mxu0 %v1173_v8  ;;  %v1169_v10 = vld [vmem:[#allocation10 + $0x3a0] sm:$0xff] }
 0x229   : > { %v791_v14 = vmax.f32 %v783_v13, 0.0  ;;  %2824 = vmatprep.subr.mxu1 %v792_v12  ;;  %1303 = vmatprep.subr.mxu0 %v1170_v9  ;;  %v1162_v13 = vld [vmem:[#allocation10 + $0x368] sm:$0xff] }
 0x22a   : > { %2825 = vmatpush3.msra.mxu1 %v792_v12  ;;  %1304 = vmatpush2.msra.mxu0 %v1169_v10  ;;  %v1165_v12 = vld [vmem:[#allocation10 + $0x380] sm:$0xff] }
 0x22b   : > { %2826 = vmatprep.subr.mxu1 %v791_v14  ;;  %1305 = vmatprep.subr.mxu0 %v1166_v11 }
 0x22c   : > { %2827 = vmatpush3.msra.mxu1 %v791_v14  ;;  %1306 = vmatpush2.msra.mxu0 %v1165_v12  ;;  %v1161_v14 = vld [vmem:[#allocation10 + $0x360] sm:$0xff] }
 0x22d   : > { %2829 = vmatmul.mubr.msk.f32.vlgmr.msra.gmra.mxu1 %vm619_vm0, %v613_v3  ;;  %2831 = vmatprep.subr.mxu1 %v883_v15  ;;  %v4341_v3 = vmov 0.0  }
 0x22e   : > { %2832 = vmatpush3.msra.mxu1 %v883_v15  ;;  %1331 = vmatprep.mubr.f32.mxu0 %v4341_v3  ;;  %v1158_v15 = vld [vmem:[#allocation10 + $0x348] sm:$0xff] }
 0x22f   : > { %2833 = vmatprep.subr.mxu1 %v882_v16  ;;  %1307 = vmatprep.subr.mxu0 %v1162_v13 }
 0x230   : > { %2834 = vmatpush3.msra.mxu1 %v882_v16  ;;  %1308 = vmatpush2.msra.mxu0 %v1161_v14  ;;  %v1157_v16 = vld [vmem:[#allocation10 + $0x340] sm:$0xff] }
 0x231   : > { %2835 = vmatprep.subr.mxu1 %v881_v17  ;;  %1309 = vmatprep.subr.mxu0 %v1158_v15  ;;  %v971_v15 = vpop.permute.xlu0 %970 }
 0x232   : > { %2836 = vmatpush3.msra.mxu1 %v881_v17  ;;  %1310 = vmatpush2.msra.mxu0 %v1157_v16  ;;  %v1154_v17 = vld [vmem:[#allocation10 + $0x328] sm:$0xff] }
 0x233   : > { %2837 = vmatprep.subr.mxu1 %v880_v18  ;;  %1311 = vmatprep.subr.mxu0 %v1154_v17  ;;  %v3797_v17 = vld [vmem:[%s3789_s9] sm:$0x3] }
 0x234   : > { %2838 = vmatpush3.msra.mxu1 %v880_v18  ;;  %v1153_v18 = vld [vmem:[#allocation10 + $0x320] sm:$0xff]  ;;  %4436 = vst [vmem:[#allocation26_spill] sm:$0xff] %v3797_v17 }
 0x235   : > { %2839 = vmatprep.subr.mxu1 %v879_v19  ;;  %1312 = vmatpush2.msra.mxu0 %v1153_v18  ;;  %v3799_v18 = vld [vmem:[#allocation10 + $0x5e8] sm:$0xff] }
 0x236   : > { %2840 = vmatpush3.msra.mxu1 %v879_v19  ;;  %v1150_v19 = vld [vmem:[#allocation10 + $0x308] sm:$0xff] }
 0x237   : > { %2841 = vmatprep.subr.mxu1 %v878_v20  ;;  %1313 = vmatprep.subr.mxu0 %v1150_v19  ;;  %v3802_v19 = vld [vmem:[#allocation10 + $0x5e0] sm:$0xff] }
 0x238   : > { %2842 = vmatpush3.msra.mxu1 %v878_v20  ;;  %v1149_v20 = vld [vmem:[#allocation10 + $0x300] sm:$0xff] }
 0x239   : > { %2843 = vmatprep.subr.mxu1 %v877_v21  ;;  %1314 = vmatpush2.msra.mxu0 %v1149_v20  ;;  %v3805_v20 = vld [vmem:[#allocation10 + $0x5c8] sm:$0xff] }
 0x23a   : > { %2844 = vmatpush3.msra.mxu1 %v877_v21  ;;  %v1146_v21 = vld [vmem:[#allocation10 + $0x2e8] sm:$0xff] }
 0x23b   : > { %2845 = vmatprep.subr.mxu1 %v876_v22  ;;  %1315 = vmatprep.subr.mxu0 %v1146_v21  ;;  %v3810_v21 = vld [vmem:[#allocation10 + $0x5c0] sm:$0xff] }
 0x23c   : > { %2846 = vmatpush3.msra.mxu1 %v876_v22  ;;  %v1145_v22 = vld [vmem:[#allocation10 + $0x2e0] sm:$0xff] }
 0x23d   : > { %2847 = vmatprep.subr.mxu1 %v875_v23  ;;  %1316 = vmatpush2.msra.mxu0 %v1145_v22  ;;  %v3813_v22 = vld [vmem:[#allocation10 + $0x5a8] sm:$0xff] }
 0x23e   : > { %2848 = vmatpush3.msra.mxu1 %v875_v23  ;;  %v1142_v23 = vld [vmem:[#allocation10 + $0x2c8] sm:$0xff] }
 0x23f   : > { %2849 = vmatprep.subr.mxu1 %v874_v24  ;;  %1317 = vmatprep.subr.mxu0 %v1142_v23  ;;  %v3817_v23 = vld [vmem:[#allocation10 + $0x5a0] sm:$0xff] }
 0x240   : > { %2850 = vmatpush3.msra.mxu1 %v874_v24  ;;  %v1141_v24 = vld [vmem:[#allocation10 + $0x2c0] sm:$0xff] }
 0x241   : > { %2851 = vmatprep.subr.mxu1 %v873_v25  ;;  %1318 = vmatpush2.msra.mxu0 %v1141_v24  ;;  %v3820_v24 = vld [vmem:[#allocation10 + $0x588] sm:$0xff] }
 0x242   : > { %2852 = vmatpush3.msra.mxu1 %v873_v25  ;;  %v1138_v25 = vld [vmem:[#allocation10 + $0x2a8] sm:$0xff] }
 0x243   : > { %2853 = vmatprep.subr.mxu1 %v872_v26  ;;  %1319 = vmatprep.subr.mxu0 %v1138_v25  ;;  %v3823_v25 = vld [vmem:[#allocation10 + $0x580] sm:$0xff] }
 0x244   : > { %2854 = vmatpush3.msra.mxu1 %v872_v26  ;;  %v1137_v26 = vld [vmem:[#allocation10 + $0x2a0] sm:$0xff] }
 0x245   : > { %2855 = vmatprep.subr.mxu1 %v871_v27  ;;  %1320 = vmatpush2.msra.mxu0 %v1137_v26  ;;  %v3826_v26 = vld [vmem:[#allocation10 + $0x568] sm:$0xff] }
 0x246   : > { %2856 = vmatpush3.msra.mxu1 %v871_v27  ;;  %v1134_v27 = vld [vmem:[#allocation10 + $0x288] sm:$0xff] }
 0x247   : > { %2857 = vmatprep.subr.mxu1 %v870_v28  ;;  %1321 = vmatprep.subr.mxu0 %v1134_v27  ;;  %v3829_v27 = vld [vmem:[#allocation10 + $0x560] sm:$0xff] }
 0x248   : > { %2858 = vmatpush3.msra.mxu1 %v870_v28  ;;  %v1133_v28 = vld [vmem:[#allocation10 + $0x280] sm:$0xff] }
 0x249   : > { %2859 = vmatprep.subr.mxu1 %v869_v29  ;;  %1322 = vmatpush2.msra.mxu0 %v1133_v28  ;;  %v3832_v28 = vld [vmem:[#allocation10 + $0x548] sm:$0xff] }
 0x24a   : > { %2860 = vmatpush3.msra.mxu1 %v869_v29  ;;  %v1130_v29 = vld [vmem:[#allocation10 + $0x268] sm:$0xff] }
 0x24b   : > { %2861 = vmatprep.subr.mxu1 %v868_v30  ;;  %1323 = vmatprep.subr.mxu0 %v1130_v29  ;;  %v3835_v29 = vld [vmem:[#allocation10 + $0x540] sm:$0xff] }
 0x24c   : > { %2862 = vmatpush3.msra.mxu1 %v868_v30  ;;  %v1129_v30 = vld [vmem:[#allocation10 + $0x260] sm:$0xff] }
 0x24d   : > { %2866 = vmatprep.subr.mxu1 %v4341_v3  ;;  %1324 = vmatpush2.msra.mxu0 %v1129_v30  ;;  %v3838_v30 = vld [vmem:[#allocation10 + $0x528] sm:$0xff] }
 0x24e   : > { %1325 = vmatprep.subr.mxu0 %v1126_v31  ;;  %v3841_v31 = vld [vmem:[#allocation10 + $0x520] sm:$0xff] }
 0x24f   : > { %1326 = vmatpush2.msra.mxu0 %v1125_v32  ;;  %v3844_v32 = vld [vmem:[#allocation10 + $0x508] sm:$0xff] }
 0x250   : > { %1327 = vmatprep.subr.mxu0 %v1122_v33  ;;  %v3847_v33 = vld [vmem:[#allocation10 + $0x500] sm:$0xff] }
 0x251   : > { %1328 = vmatpush2.msra.mxu0 %v1121_v34  ;;  %v3850_v34 = vld [vmem:[#allocation10 + $0x4e8] sm:$0xff] }
 0x252   : > { %1329 = vmatprep.subr.mxu0 %v1118_v35  ;;  %v3853_v35 = vld [vmem:[#allocation10 + $0x4e0] sm:$0xff] }
 0x253   : > { %1330 = vmatpush2.msra.mxu0 %v1117_v36  ;;  %v3856_v36 = vld [vmem:[#allocation10 + $0x4c8] sm:$0xff] }
 0x254   : > { %1332 = vmatmul.mubr.f32.vlgmr.msra.gmra.mxu0 %v4341_v3  ;;  %1480 = vmatprep.subr.mxu0 %v1244_v37  ;;  %v3859_v37 = vld [vmem:[#allocation10 + $0x4c0] sm:$0xff] }
 0x255   : > { %1544 = vmatprep.mubr.f32.mxu0 %v4341_v3  ;;  %1481 = vmatpush1.msra.mxu0 %v1243_v38  ;;  %v3862_v38 = vld [vmem:[#allocation10 + $0x4a8] sm:$0xff] }
 0x256   : > { %1482 = vmatprep.subr.mxu0 %v1240_v39  ;;  %v3865_v39 = vld [vmem:[#allocation10 + $0x4a0] sm:$0xff] }
 0x257   : > { %1483 = vmatpush1.msra.mxu0 %v1239_v40  ;;  %v3868_v40 = vld [vmem:[#allocation10 + $0x488] sm:$0xff] }
 0x258   : > { %1484 = vmatprep.subr.mxu0 %v1236_v41  ;;  %v3871_v41 = vld [vmem:[#allocation10 + $0x480] sm:$0xff] }
 0x259   : > { %1485 = vmatpush1.msra.mxu0 %v1235_v42  ;;  %v3874_v42 = vld [vmem:[#allocation10 + $0x468] sm:$0xff] }
 0x25a   : > { %1486 = vmatprep.subr.mxu0 %v1232_v43  ;;  %v3877_v43 = vld [vmem:[#allocation10 + $0x460] sm:$0xff] }
 0x25b   : > { %1487 = vmatpush1.msra.mxu0 %v1231_v44  ;;  %v3880_v44 = vld [vmem:[#allocation10 + $0x448] sm:$0xff] }
 0x25c   : > { %1488 = vmatprep.subr.mxu0 %v1228_v45  ;;  %v3883_v45 = vld [vmem:[#allocation10 + $0x440] sm:$0xff] }
 0x25d   : > { %1489 = vmatpush1.msra.mxu0 %v1227_v46  ;;  %v3886_v46 = vld [vmem:[#allocation10 + $0x428] sm:$0xff] }
 0x25e   : > { %1490 = vmatprep.subr.mxu0 %v1224_v47  ;;  %v3889_v47 = vld [vmem:[#allocation10 + $0x420] sm:$0xff] }
 0x25f   : > { %1491 = vmatpush1.msra.mxu0 %v1223_v48  ;;  %v3892_v48 = vld [vmem:[#allocation10 + $0x408] sm:$0xff] }
 0x260   : > { %1492 = vmatprep.subr.mxu0 %v1220_v49  ;;  %v3895_v49 = vld [vmem:[#allocation10 + $0x400] sm:$0xff] }
 0x261   : > { %1493 = vmatpush1.msra.mxu0 %v1219_v50  ;;  %v3898_v50 = vld [vmem:[#allocation10 + $0x1f8] sm:$0xff] }
 0x262   : > { %1494 = vmatprep.subr.mxu0 %v1216_v51  ;;  %v3901_v51 = vld [vmem:[#allocation10 + $0x1f0] sm:$0xff] }
 0x263   : > { %1495 = vmatpush1.msra.mxu0 %v1215_v52  ;;  %v3904_v52 = vld [vmem:[#allocation10 + $0x1d8] sm:$0xff] }
 0x264   : > { %1496 = vmatprep.subr.mxu0 %v1212_v53  ;;  %v3908_v53 = vld [vmem:[#allocation10 + $0x1d0] sm:$0xff] }
 0x265   : > { %1497 = vmatpush1.msra.mxu0 %v1211_v54  ;;  %v3911_v54 = vld [vmem:[#allocation10 + $0x1b8] sm:$0xff] }
 0x266   : > { %1498 = vmatprep.subr.mxu0 %v1208_v55  ;;  %v3915_v55 = vld [vmem:[#allocation10 + $0x1b0] sm:$0xff] }
 0x267   : > { %1499 = vmatpush1.msra.mxu0 %v1207_v56  ;;  %v3918_v56 = vld [vmem:[#allocation10 + $0x198] sm:$0xff] }
 0x268   : > { %1500 = vmatprep.subr.mxu0 %v1204_v57  ;;  %v3921_v57 = vld [vmem:[#allocation10 + $0x190] sm:$0xff] }
 0x2ed   : > { %v2830_v58 = vpop.f32.mrf.mxu1 }
 0x2ef   : > { %v859_v59 = vpop.f32.mrf.mxu1 }
 0x2f0   : > { %2863 = vmatprep.mubr.f32.mxu1 %v859_v59  ;;  %v1200_v59 = vld [vmem:[#allocation10 + $0x498] sm:$0xff] }
 0x2f1   : > { %2864 = vmatmul.mubr.f32.vlgmr.msra.gmra.mxu1 %v2830_v58  ;;  %v1203_v58 = vld [vmem:[#allocation10 + $0x4b0] sm:$0xff] }
 0x2f2   : > { %2870 = vmatprep.mubr.msk.f32.mxu1 %vm3411_vm1, %v4341_v3  ;;  %1501 = vmatpush1.msra.mxu0 %v1203_v58  ;;  %v3924_v58 = vld [vmem:[#allocation10 + $0x178] sm:$0xff] }
 0x2f3   : > { %1502 = vmatprep.subr.mxu0 %v1200_v59  ;;  %4437 = vst [vmem:[#allocation27_spill] sm:$0xff] %v3924_v58  ;;  %v3927_v59 = vld [vmem:[#allocation10 + $0x170] sm:$0xff] }
 0x2f4   : > { %1503 = vmatpush1.msra.mxu0 %v1199_v60  ;;  %4438 = vst [vmem:[#allocation28_spill] sm:$0xff] %v3927_v59  ;;  %v3930_v60 = vld [vmem:[#allocation10 + $0x158] sm:$0xff] }
 0x2f5   : > { %1504 = vmatprep.subr.mxu0 %v1196_v61  ;;  %4439 = vst [vmem:[#allocation29_spill] sm:$0xff] %v3930_v60  ;;  %v3933_v61 = vld [vmem:[#allocation10 + $0x150] sm:$0xff] }
 0x2f6   : > { %1505 = vmatpush1.msra.mxu0 %v1195_v62  ;;  %4440 = vst [vmem:[#allocation30_spill] sm:$0xff] %v3933_v61  ;;  %v3936_v62 = vld [vmem:[#allocation10 + $0x138] sm:$0xff] }
 0x2f7   : > { %1506 = vmatprep.subr.mxu0 %v1192_v63  ;;  %4441 = vst [vmem:[#allocation31_spill] sm:$0xff] %v3936_v62  ;;  %v3939_v63 = vld [vmem:[#allocation10 + $0x130] sm:$0xff] }
 0x2f8   : > { %1507 = vmatpush1.msra.mxu0 %v1191_v0  ;;  %4442 = vst [vmem:[#allocation32_spill] sm:$0xff] %v3939_v63  ;;  %v3942_v0 = vld [vmem:[#allocation10 + $0x118] sm:$0xff] }
 0x2f9   : > { %1508 = vmatprep.subr.mxu0 %v1188_v1  ;;  %4443 = vst [vmem:[#allocation33_spill] sm:$0xff] %v3942_v0  ;;  %v3945_v1 = vld [vmem:[#allocation10 + $0x110] sm:$0xff] }
 0x2fa   : > { %1509 = vmatpush1.msra.mxu0 %v1187_v2  ;;  %4444 = vst [vmem:[#allocation34_spill] sm:$0xff] %v3945_v1  ;;  %v3948_v2 = vld [vmem:[#allocation10 + $0xf8] sm:$0xff] }
 0x2fb   : > { %1510 = vmatprep.subr.mxu0 %v1184_v4  ;;  %4445 = vst [vmem:[#allocation35_spill] sm:$0xff] %v3948_v2  ;;  %v3951_v4 = vld [vmem:[#allocation10 + $0xf0] sm:$0xff] }
 0x2fc   : > { %1511 = vmatpush1.msra.mxu0 %v1183_v5  ;;  %4446 = vst [vmem:[#allocation36_spill] sm:$0xff] %v3951_v4  ;;  %v3954_v5 = vld [vmem:[#allocation10 + $0xd8] sm:$0xff] }
 0x2fd   : > { %1545 = vmatmul.mubr.f32.vlgmr.msra.gmra.mxu0 %v4341_v3  ;;  %2878 = vmatprep.subr.mxu0 %v4341_v3  ;;  %4447 = vst [vmem:[#allocation37_spill] sm:$0xff] %v3954_v5 }
 0x2fe   : > { %2882 = vmatprep.mubr.msk.f32.mxu0 %vm3411_vm1, %v4341_v3 }
 0x3b1   : > { %v2865_v8 = vpop.f32.mrf.mxu1 }
 0x3b2   : > { %v963_v9 = vadd.f32 %v2865_v8, %v2703_v6  ;;  %v3963_v8 = vld [vmem:[#allocation10 + $0xb0] sm:$0xff] }
 0x3b3   : > { %v957_v10 = vpop.f32.mrf.mxu1  ;;  %4450 = vst [vmem:[#allocation40_spill] sm:$0xff] %v3963_v8 }
 0x3b4   : > { %v967_v11 = vmax.f32 %v963_v9, 0.0  ;;  %v958_v12 = vadd.f32 %v2703_v6, %v957_v10  ;;  %v3957_v6 = vld [vmem:[#allocation10 + $0xd0] sm:$0xff]  ;;  %v3966_v9 = vld [vmem:[#allocation10 + $0x98] sm:$0xff] }
 0x3b5   : > { %4448 = vst [vmem:[#allocation38_spill] sm:$0xff] %v3957_v6  ;;  %4451 = vst [vmem:[#allocation41_spill] sm:$0xff] %v3966_v9  ;;  %v3969_v10 = vld [vmem:[#allocation10 + $0x90] sm:$0xff] }
 0x3b6   : > { %v3791_v13 = vmul.f32 %v976_v7, %v967_v11  ;;  %v966_v14 = vmax.f32 %v958_v12, 0.0  ;;  %v3960_v7 = vld [vmem:[#allocation10 + $0xb8] sm:$0xff]  ;;  %4452 = vst [vmem:[#allocation42_spill] sm:$0xff] %v3969_v10  ;;  %v3975_v12 = vld [vmem:[#allocation10 + $0x70] sm:$0xff] }
 0x3b7   : > { %4449 = vst [vmem:[#allocation39_spill] sm:$0xff] %v3960_v7  ;;  %v3972_v11 = vld [vmem:[#allocation10 + $0x78] sm:$0xff]  ;;  %4454 = vst [vmem:[#allocation44_spill] sm:$0xff] %v3975_v12 }
 0x3b8   : > { %v3793_v16 = vmul.f32 %v971_v15, %v966_v14  ;;  %2867 = vmatpush3.msra.mxu1 %v3791_v13  ;;  %4453 = vst [vmem:[#allocation43_spill] sm:$0xff] %v3972_v11  ;;  %v3978_v14 = vld [vmem:[#allocation10 + $0x58] sm:$0xff]  ;;  %v3981_v15 = vld [vmem:[#allocation10 + $0x50] sm:$0xff] }
 0x3b9   : > { %2868 = vmatprep.subr.mxu1 %v4341_v3  ;;  %4455 = vst [vmem:[#allocation45_spill] sm:$0xff] %v3978_v14  ;;  %4456 = vst [vmem:[#allocation46_spill] sm:$0xff] %v3981_v15 }
 0x3ba   : > { %4435 = vst [vmem:[#allocation25_spill] sm:$0xff] %v3793_v16  ;;  %2869 = vmatpush3.msra.mxu1 %v3793_v16 }
 0x3bb   : > { %2871 = vmatmul.mubr.msk.f32.vlgmr.msra.gmra.mxu1 %vm619_vm0, %v3797_v17  ;;  %1338 = vmatprep.subr.mxu1 %v3799_v18  ;;  %v3987_v17 = vld [vmem:[#allocation10 + $0x30] sm:$0xff] }
 0x3bc   : > { %1339 = vmatpush1.msra.mxu1 %v3802_v19  ;;  %1402 = vmatprep.mubr.f32.mxu1 %v4341_v3  ;;  %4458 = vst [vmem:[#allocation48_spill] sm:$0xff] %v3987_v17 }
 0x3bd   : > { %1340 = vmatprep.subr.mxu1 %v3805_v20 }
 0x3be   : > { %1341 = vmatpush1.msra.mxu1 %v3810_v21 }
 0x3bf   : > { %1342 = vmatprep.subr.mxu1 %v3813_v22 }
 0x3c0   : > { %1343 = vmatpush1.msra.mxu1 %v3817_v23 }
 0x3c1   : > { %1344 = vmatprep.subr.mxu1 %v3820_v24 }
 0x3c2   : > { %1345 = vmatpush1.msra.mxu1 %v3823_v25 }
 0x3c3   : > { %1346 = vmatprep.subr.mxu1 %v3826_v26 }
 0x3c4   : > { %1347 = vmatpush1.msra.mxu1 %v3829_v27 }
 0x3c5   : > { %1348 = vmatprep.subr.mxu1 %v3832_v28 }
 0x3c6   : > { %1349 = vmatpush1.msra.mxu1 %v3835_v29 }
 0x3c7   : > { %1350 = vmatprep.subr.mxu1 %v3838_v30 }
 0x3c8   : > { %1351 = vmatpush1.msra.mxu1 %v3841_v31 }
 0x3c9   : > { %1352 = vmatprep.subr.mxu1 %v3844_v32 }
 0x3ca   : > { %1353 = vmatpush1.msra.mxu1 %v3847_v33 }
 0x3cb   : > { %1354 = vmatprep.subr.mxu1 %v3850_v34 }
 0x3cc   : > { %1355 = vmatpush1.msra.mxu1 %v3853_v35 }
 0x3cd   : > { %1356 = vmatprep.subr.mxu1 %v3856_v36 }
 0x3ce   : > { %1357 = vmatpush1.msra.mxu1 %v3859_v37 }
 0x3cf   : > { %1358 = vmatprep.subr.mxu1 %v3862_v38 }
 0x3d0   : > { %1359 = vmatpush1.msra.mxu1 %v3865_v39 }
 0x3d1   : > { %1360 = vmatprep.subr.mxu1 %v3868_v40 }
 0x3d2   : > { %1361 = vmatpush1.msra.mxu1 %v3871_v41 }
 0x3d3   : > { %1362 = vmatprep.subr.mxu1 %v3874_v42 }
 0x3d4   : > { %1363 = vmatpush1.msra.mxu1 %v3877_v43 }
 0x3d5   : > { %1364 = vmatprep.subr.mxu1 %v3880_v44 }
 0x3d6   : > { %1365 = vmatpush1.msra.mxu1 %v3883_v45 }
 0x3d7   : > { %1366 = vmatprep.subr.mxu1 %v3886_v46 }
 0x3d8   : > { %1367 = vmatpush1.msra.mxu1 %v3889_v47 }
 0x3d9   : > { %1368 = vmatprep.subr.mxu1 %v3892_v48 }
 0x3da   : > { %1369 = vmatpush1.msra.mxu1 %v3895_v49 }
 0x3db   : > { %1403 = vmatmul.mubr.f32.vlgmr.msra.gmra.mxu1 %v4341_v3  ;;  %1409 = vmatprep.subr.mxu1 %v3898_v50 }
 0x3dc   : > { %1410 = vmatpush1.msra.mxu1 %v3901_v51  ;;  %1473 = vmatprep.mubr.f32.mxu1 %v4341_v3  ;;  %v3984_v3 = vld [vmem:[#allocation10 + $0x38] sm:$0xff] }
 0x3dd   : > { %1411 = vmatprep.subr.mxu1 %v3904_v52  ;;  %4457 = vst [vmem:[#allocation47_spill] sm:$0xff] %v3984_v3 }
 0x3de   : > { %1412 = vmatpush1.msra.mxu1 %v3908_v53 }
 0x3df   : > { %1413 = vmatprep.subr.mxu1 %v3911_v54 }
 0x3e0   : > { %1414 = vmatpush1.msra.mxu1 %v3915_v55 }
 0x3e1   : > { %1415 = vmatprep.subr.mxu1 %v3918_v56 }
 0x3e2   : > { %1416 = vmatpush1.msra.mxu1 %v3921_v57 }
 0x3e3   : > { %1417 = vmatprep.subr.mxu1 %v3924_v58 }
 0x3e4   : > { %1418 = vmatpush1.msra.mxu1 %v3927_v59 }
 0x3e5   : > { %1419 = vmatprep.subr.mxu1 %v3930_v60 }
 0x3e6   : > { %1420 = vmatpush1.msra.mxu1 %v3933_v61 }
 0x3e7   : > { %1421 = vmatprep.subr.mxu1 %v3936_v62 }
 0x3e8   : > { %1422 = vmatpush1.msra.mxu1 %v3939_v63 }
 0x3e9   : > { %1423 = vmatprep.subr.mxu1 %v3942_v0 }
 0x3ea   : > { %1424 = vmatpush1.msra.mxu1 %v3945_v1 }
 0x3eb   : > { %1425 = vmatprep.subr.mxu1 %v3948_v2 }
 0x3ec   : > { %1426 = vmatpush1.msra.mxu1 %v3951_v4 }
 0x3ed   : > { %1427 = vmatprep.subr.mxu1 %v3954_v5 }
 0x3ee   : > { %1428 = vmatpush1.msra.mxu1 %v3957_v6 }
 0x3ef   : > { %1429 = vmatprep.subr.mxu1 %v3960_v7 }
 0x3f0   : > { %1430 = vmatpush1.msra.mxu1 %v3963_v8 }
 0x3f1   : > { %1431 = vmatprep.subr.mxu1 %v3966_v9  ;;  %v3990_v9 = vld [vmem:[#allocation10 + $0x18] sm:$0xff] }
 0x3f2   : > { %1432 = vmatpush1.msra.mxu1 %v3969_v10  ;;  %4459 = vst [vmem:[#allocation49_spill] sm:$0xff] %v3990_v9  ;;  %v3993_v10 = vld [vmem:[#allocation10 + $0x10] sm:$0xff] }
 0x3f3   : > { %1433 = vmatprep.subr.mxu1 %v3972_v11  ;;  %4460 = vst [vmem:[#allocation50_spill] sm:$0xff] %v3993_v10  ;;  %v3996_v11 = vld [vmem:[#allocation10 + $0x3f8] sm:$0xff] }
 0x3f4   : > { %1434 = vmatpush1.msra.mxu1 %v3975_v12  ;;  %4461 = vst [vmem:[#allocation51_spill] sm:$0xff] %v3996_v11  ;;  %v3999_v12 = vld [vmem:[#allocation10 + $0x3f0] sm:$0xff] }
 0x3f5   : > { %1435 = vmatprep.subr.mxu1 %v3978_v14  ;;  %4462 = vst [vmem:[#allocation52_spill] sm:$0xff] %v3999_v12  ;;  %v4002_v14 = vld [vmem:[#allocation10 + $0x3d8] sm:$0xff] }
 0x3f6   : > { %1436 = vmatpush1.msra.mxu1 %v3981_v15  ;;  %4463 = vst [vmem:[#allocation53_spill] sm:$0xff] %v4002_v14  ;;  %v4005_v15 = vld [vmem:[#allocation10 + $0x3d0] sm:$0xff] }
 0x3f7   : > { %1437 = vmatprep.subr.mxu1 %v3984_v3  ;;  %4464 = vst [vmem:[#allocation54_spill] sm:$0xff] %v4005_v15  ;;  %v4008_v3 = vld [vmem:[#allocation10 + $0x3b8] sm:$0xff] }
 0x3f8   : > { %1438 = vmatpush1.msra.mxu1 %v3987_v17  ;;  %4465 = vst [vmem:[#allocation55_spill] sm:$0xff] %v4008_v3  ;;  %v4011_v17 = vld [vmem:[#allocation10 + $0x3b0] sm:$0xff] }
 0x3f9   : > { %1439 = vmatprep.subr.mxu1 %v3990_v9  ;;  %4466 = vst [vmem:[#allocation56_spill] sm:$0xff] %v4011_v17  ;;  %v4014_v9 = vld [vmem:[#allocation10 + $0x398] sm:$0xff] }
 0x3fa   : > { %1440 = vmatpush1.msra.mxu1 %v3993_v10  ;;  %4467 = vst [vmem:[#allocation57_spill] sm:$0xff] %v4014_v9  ;;  %v4017_v10 = vld [vmem:[#allocation10 + $0x390] sm:$0xff] }
 0x3fb   : > { %1441 = vmatprep.subr.mxu1 %v3996_v11  ;;  %4468 = vst [vmem:[#allocation58_spill] sm:$0xff] %v4017_v10  ;;  %v4020_v11 = vld [vmem:[#allocation10 + $0x378] sm:$0xff] }
 0x3fc   : > { %1442 = vmatpush2.msra.mxu1 %v3999_v12  ;;  %4469 = vst [vmem:[#allocation59_spill] sm:$0xff] %v4020_v11  ;;  %v4023_v12 = vld [vmem:[#allocation10 + $0x370] sm:$0xff] }
 0x3fd   : > { %1443 = vmatprep.subr.mxu1 %v4002_v14  ;;  %4470 = vst [vmem:[#allocation60_spill] sm:$0xff] %v4023_v12  ;;  %v4026_v14 = vld [vmem:[#allocation10 + $0x358] sm:$0xff] }
 0x3fe   : > { %1444 = vmatpush2.msra.mxu1 %v4005_v15  ;;  %4471 = vst [vmem:[#allocation61_spill] sm:$0xff] %v4026_v14  ;;  %v4029_v15 = vld [vmem:[#allocation10 + $0x350] sm:$0xff] }
 0x3ff   : > { %1445 = vmatprep.subr.mxu1 %v4008_v3  ;;  %4472 = vst [vmem:[#allocation62_spill] sm:$0xff] %v4029_v15  ;;  %v4032_v3 = vld [vmem:[#allocation10 + $0x338] sm:$0xff] }
 0x400   : > { %1446 = vmatpush2.msra.mxu1 %v4011_v17  ;;  %4473 = vst [vmem:[#allocation63_spill] sm:$0xff] %v4032_v3  ;;  %v4035_v17 = vld [vmem:[#allocation10 + $0x330] sm:$0xff] }
 0x401   : > { %1447 = vmatprep.subr.mxu1 %v4014_v9  ;;  %4474 = vst [vmem:[#allocation64_spill] sm:$0xff] %v4035_v17  ;;  %v4038_v9 = vld [vmem:[#allocation10 + $0x318] sm:$0xff] }
 0x402   : > { %1448 = vmatpush2.msra.mxu1 %v4017_v10  ;;  %4475 = vst [vmem:[#allocation65_spill] sm:$0xff] %v4038_v9  ;;  %v4041_v10 = vld [vmem:[#allocation10 + $0x310] sm:$0xff] }
 0x403   : > { %1449 = vmatprep.subr.mxu1 %v4020_v11  ;;  %4476 = vst [vmem:[#allocation66_spill] sm:$0xff] %v4041_v10  ;;  %v4044_v11 = vld [vmem:[#allocation10 + $0x2f8] sm:$0xff] }
 0x404   : > { %1450 = vmatpush2.msra.mxu1 %v4023_v12  ;;  %4477 = vst [vmem:[#allocation67_spill] sm:$0xff] %v4044_v11  ;;  %v4047_v12 = vld [vmem:[#allocation10 + $0x2f0] sm:$0xff] }
 0x405   : > { %1451 = vmatprep.subr.mxu1 %v4026_v14  ;;  %4478 = vst [vmem:[#allocation68_spill] sm:$0xff] %v4047_v12  ;;  %v4050_v14 = vld [vmem:[#allocation10 + $0x2d8] sm:$0xff] }
 0x406   : > { %1452 = vmatpush2.msra.mxu1 %v4029_v15  ;;  %4479 = vst [vmem:[#allocation69_spill] sm:$0xff] %v4050_v14  ;;  %v4053_v15 = vld [vmem:[#allocation10 + $0x2d0] sm:$0xff] }
 0x407   : > { %1453 = vmatprep.subr.mxu1 %v4032_v3  ;;  %4480 = vst [vmem:[#allocation70_spill] sm:$0xff] %v4053_v15  ;;  %v4056_v3 = vld [vmem:[#allocation10 + $0x2b8] sm:$0xff] }
 0x408   : > { %1454 = vmatpush2.msra.mxu1 %v4035_v17  ;;  %4481 = vst [vmem:[#allocation71_spill] sm:$0xff] %v4056_v3  ;;  %v4059_v17 = vld [vmem:[#allocation10 + $0x2b0] sm:$0xff] }
 0x409   : > { %1455 = vmatprep.subr.mxu1 %v4038_v9  ;;  %4482 = vst [vmem:[#allocation72_spill] sm:$0xff] %v4059_v17  ;;  %v4062_v9 = vld [vmem:[#allocation10 + $0x298] sm:$0xff] }
 0x40a   : > { %1456 = vmatpush2.msra.mxu1 %v4041_v10  ;;  %4483 = vst [vmem:[#allocation73_spill] sm:$0xff] %v4062_v9  ;;  %v4065_v10 = vld [vmem:[#allocation10 + $0x290] sm:$0xff] }
 0x40b   : > { %1457 = vmatprep.subr.mxu1 %v4044_v11  ;;  %4484 = vst [vmem:[#allocation74_spill] sm:$0xff] %v4065_v10  ;;  %v4068_v11 = vld [vmem:[#allocation10 + $0x278] sm:$0xff] }
 0x40c   : > { %1458 = vmatpush2.msra.mxu1 %v4047_v12  ;;  %4485 = vst [vmem:[#allocation75_spill] sm:$0xff] %v4068_v11  ;;  %v4071_v12 = vld [vmem:[#allocation10 + $0x270] sm:$0xff] }
 0x40d   : > { %1459 = vmatprep.subr.mxu1 %v4050_v14  ;;  %4486 = vst [vmem:[#allocation76_spill] sm:$0xff] %v4071_v12  ;;  %v4074_v14 = vld [vmem:[#allocation10 + $0x258] sm:$0xff] }
 0x40e   : > { %1460 = vmatpush2.msra.mxu1 %v4053_v15  ;;  %4487 = vst [vmem:[#allocation77_spill] sm:$0xff] %v4074_v14  ;;  %v4077_v15 = vld [vmem:[#allocation10 + $0x250] sm:$0xff] }
 0x40f   : > { %1461 = vmatprep.subr.mxu1 %v4056_v3  ;;  %4488 = vst [vmem:[#allocation78_spill] sm:$0xff] %v4077_v15  ;;  %v4080_v3 = vld [vmem:[#allocation10 + $0x238] sm:$0xff] }
 0x410   : > { %1462 = vmatpush2.msra.mxu1 %v4059_v17  ;;  %4489 = vst [vmem:[#allocation79_spill] sm:$0xff] %v4080_v3  ;;  %v4083_v17 = vld [vmem:[#allocation10 + $0x230] sm:$0xff] }
 0x411   : > { %1463 = vmatprep.subr.mxu1 %v4062_v9  ;;  %4490 = vst [vmem:[#allocation80_spill] sm:$0xff] %v4083_v17  ;;  %v4086_v9 = vld [vmem:[#allocation10 + $0x218] sm:$0xff] }
 0x412   : > { %1464 = vmatpush2.msra.mxu1 %v4065_v10  ;;  %4491 = vst [vmem:[#allocation81_spill] sm:$0xff] %v4086_v9  ;;  %v4089_v10 = vld [vmem:[#allocation10 + $0x210] sm:$0xff] }
 0x413   : > { %1465 = vmatprep.subr.mxu1 %v4068_v11  ;;  %4492 = vst [vmem:[#allocation82_spill] sm:$0xff] %v4089_v10 }
 0x414   : > { %1466 = vmatpush2.msra.mxu1 %v4071_v12  ;;  %v4493_v12 = vmov 0.0  }
 0x415   : > { %1467 = vmatprep.subr.mxu1 %v4074_v14 }
 0x416   : > { %1468 = vmatpush2.msra.mxu1 %v4077_v15  ;;  %v1247_v15 = vlaneseq }
 0x417   : > { %1469 = vmatprep.subr.mxu1 %v4080_v3  ;;  %v1245_v3 = vld [vmem:[%s4325_s10] sm:$0xf] }
 0x418   : > { %1470 = vmatpush2.msra.mxu1 %v4083_v17  ;;  %v1248_v8 = vshrl.u32 %v1247_v15, 7  ;;  %v1333_v17 = vpop.f32.mrf.mxu0 }
 0x419   : > { %1471 = vmatprep.subr.mxu1 %v4086_v9 }
 0x41a   : > { %1472 = vmatpush2.msra.mxu1 %v4089_v10  ;;  %v1253_v7 = vsub.s32 1, %v1248_v8  ;;  %v1249_v6 = vsub.s32 0, %v1248_v8  ;;  %v1335_v10 = vpop.f32.mrf.mxu0  ;;  %v1257_v63 = vsub.s32 2, %v1248_v8  ;;  %v1261_v62 = vsub.s32 3, %v1248_v8 }
 0x41b   : > { %1474 = vmatmul.mubr.f32.vlgmr.msra.gmra.mxu1 %v4493_v12 }
 0x41c   : > { %2875 = vmatprep.mubr.f32.mxu1 %v3793_v16  ;;  %v4101_v5 = vrot.slane %v1245_v3, %v1253_v7  ;;  %v4103_v9 = vrot.slane %v1245_v3, %v1249_v6  ;;  %v4107_v60 = vrot.slane %v1245_v3, %v1257_v63  ;;  %v4109_v59 = vrot.slane %v1245_v3, %v1261_v62 }
 0x41e   : > { %4495 = vst [vmem:[#allocation84_spill] sm:$0xff] %v4101_v5  ;;  %v1336_v16 = vadd.f32 %v1335_v10, %v4101_v5  ;;  %v1546_v5 = vpop.f32.mrf.mxu0 }
 0x47b   : > { %v4096_v14 = vpop.f32.mrf.mxu1 }
 0x47c   : > { %4494 = vst [vmem:[#allocation83_spill] sm:$0xff] %v4096_v14  ;;  %v1334_v14 = vadd.f32 %v1333_v17, %v4103_v9 }
 0x47d   : > { %v2872_v11 = vpop.f32.mrf.mxu1 }
 0x49b   : > { %v1404_v4 = vpop.f32.mrf.mxu1 }
 0x49c   : > { %v1405_v15 = vadd.f32 %v1404_v4, %v1334_v14 }
 0x49d   : > { %v1406_v11 = vpop.f32.mrf.mxu1 }
 0x49e   : > { %v1407_v2 = vadd.f32 %v1406_v11, %v1336_v16  ;;  %v2705_v0 = vmul.f32 -1.442695, %v1405_v15 }
 0x4a0   : > { %v2706_v1 = vmul.f32 -1.442695, %v1407_v2 }
 0x4a2   : > { %3016 = vpow2.f32 %v2706_v1 }
 0x4a3   : > { %3018 = vpow2.f32 %v2705_v0  ;;  %v1548_v0 = vpop.f32.mrf.mxu0 }
 0x4af   : > { %v3017_v61 = vpop.eup %3016 }
 0x4b0   : > { %v3019_v7 = vpop.eup %3018  ;;  %v1560_v6 = vadd.f32 1.0, %v3017_v61 }
 0x4b1   : > { %v1554_v58 = vadd.f32 1.0, %v3019_v7 }
 0x4b2   : > { %3020 = vrcp.f32 %v1560_v6 }
 0x4b3   : > { %3022 = vrcp.f32 %v1554_v58 }
 0x4bf   : > { %v3021_v63 = vpop.eup %3020 }
 0x4c0   : > { %v3023_v61 = vpop.eup %3022  ;;  %v1570_v62 = vmul.f32 0.0, %v3021_v63  ;;  %v4544_v63 = vld [vmem:[#allocation75_spill] sm:$0xff] }
 0x4db   : > { %v1475_v10 = vpop.f32.mrf.mxu1 }
 0x4dc   : > { %v1476_v17 = vadd.f32 %v1475_v10, %v4107_v60  ;;  %v4536_v10 = vld [vmem:[#allocation67_spill] sm:$0xff] }
 0x4dd   : > { %v1477_v16 = vpop.f32.mrf.mxu1 }
 0x4de   : > { %v1547_v2 = vadd.f32 %v1546_v5, %v1476_v17  ;;  %v1478_v1 = vadd.f32 %v1477_v16, %v4109_v59  ;;  %v4537_v17 = vld [vmem:[#allocation68_spill] sm:$0xff]  ;;  %v4538_v16 = vld [vmem:[#allocation69_spill] sm:$0xff] }
 0x4e0   : > { %3024 = vtanh.f32 %v1547_v2  ;;  %v1549_v4 = vadd.f32 %v1548_v0, %v1478_v1  ;;  %v4539_v2 = vld [vmem:[#allocation70_spill] sm:$0xff]  ;;  %v4540_v1 = vld [vmem:[#allocation71_spill] sm:$0xff]  ;;  %v4541_v0 = vld [vmem:[#allocation72_spill] sm:$0xff] }
 0x4e2   : > { %v2707_v8 = vmul.f32 -1.442695, %v1549_v4  ;;  %v4542_v4 = vld [vmem:[#allocation73_spill] sm:$0xff] }
 0x4e4   : > { %3026 = vpow2.f32 %v2707_v8  ;;  %v4543_v8 = vld [vmem:[#allocation74_spill] sm:$0xff] }
 0x4ed   : > { %v3025_v3 = vpop.eup %3024 }
 0x4ee   : > { %v1571_v14 = vmul.f32 %v3025_v3, %v3023_v61  ;;  %v4545_v61 = vld [vmem:[#allocation76_spill] sm:$0xff]  ;;  %v4546_v3 = vld [vmem:[#allocation77_spill] sm:$0xff] }
 0x4f0   : > { %v4113_v11 = vadd.f32 %v1571_v14, %v1570_v62  ;;  %v4547_v62 = vld [vmem:[#allocation78_spill] sm:$0xff]  ;;  %v4548_v14 = vld [vmem:[#allocation79_spill] sm:$0xff] }
 0x4f1   : > { %v3027_v15 = vpop.eup %3026 }
 0x4f2   : > { %v1567_v7 = vadd.f32 1.0, %v3027_v15  ;;  %3028 = vtanh.f32 %v4113_v11  ;;  %v4549_v15 = vld [vmem:[#allocation80_spill] sm:$0xff] }
 0x4f4   : > { %3030 = vrcp.f32 %v1567_v7  ;;  %v4550_v7 = vld [vmem:[#allocation81_spill] sm:$0xff] }
 0x4ff   : > { %v3029_v5 = vpop.eup %3028 }
 0x501   : > { %v3031_v6 = vpop.eup %3030 }
 0x502   : > { %v4116_v58 = vmul.f32 %v3031_v6, %v3029_v5  ;;  %v4551_v5 = vld [vmem:[#allocation82_spill] sm:$0xff] }
 0x504   : > { %2873 = vmatprep.subr.mxu1 %v4116_v58 }
 0x505   : > { %2874 = vmatpush3.xpose.msra.mxu1 %v4116_v58 }
 0x506   : > { %1894 = vmatprep.subr.mxu1 %v3799_v18  ;;  %v4496_v18 = vld [vmem:[#allocation27_spill] sm:$0xff] }
 0x508   : > { %2876 = vmatmul.mubr.f32.vlgmr.msra.gmra.mxu1 %v3791_v13 }
 0x509   : > { %1895 = vmatpush1.msra.mxu1 %v3802_v19  ;;  %1958 = vmatprep.mubr.f32.mxu1 %v4493_v12  ;;  %v4497_v19 = vld [vmem:[#allocation28_spill] sm:$0xff] }
 0x50a   : > { %1896 = vmatprep.subr.mxu1 %v3805_v20  ;;  %v4498_v20 = vld [vmem:[#allocation29_spill] sm:$0xff] }
 0x50b   : > { %1897 = vmatpush1.msra.mxu1 %v3810_v21  ;;  %v4499_v21 = vld [vmem:[#allocation30_spill] sm:$0xff] }
 0x50c   : > { %1898 = vmatprep.subr.mxu1 %v3813_v22  ;;  %v4500_v22 = vld [vmem:[#allocation31_spill] sm:$0xff] }
 0x50d   : > { %1899 = vmatpush1.msra.mxu1 %v3817_v23  ;;  %v4501_v23 = vld [vmem:[#allocation32_spill] sm:$0xff] }
 0x50e   : > { %1900 = vmatprep.subr.mxu1 %v3820_v24  ;;  %v4502_v24 = vld [vmem:[#allocation33_spill] sm:$0xff] }
 0x50f   : > { %1901 = vmatpush1.msra.mxu1 %v3823_v25  ;;  %v4503_v25 = vld [vmem:[#allocation34_spill] sm:$0xff] }
 0x510   : > { %1902 = vmatprep.subr.mxu1 %v3826_v26  ;;  %v4504_v26 = vld [vmem:[#allocation35_spill] sm:$0xff] }
 0x511   : > { %1903 = vmatpush1.msra.mxu1 %v3829_v27  ;;  %v4505_v27 = vld [vmem:[#allocation36_spill] sm:$0xff] }
 0x512   : > { %1904 = vmatprep.subr.mxu1 %v3832_v28  ;;  %v4506_v28 = vld [vmem:[#allocation37_spill] sm:$0xff] }
 0x513   : > { %1905 = vmatpush1.msra.mxu1 %v3835_v29  ;;  %v4507_v29 = vld [vmem:[#allocation38_spill] sm:$0xff] }
 0x514   : > { %1906 = vmatprep.subr.mxu1 %v3838_v30  ;;  %v4508_v30 = vld [vmem:[#allocation39_spill] sm:$0xff] }
 0x515   : > { %1907 = vmatpush1.msra.mxu1 %v3841_v31  ;;  %v4509_v31 = vld [vmem:[#allocation40_spill] sm:$0xff] }
 0x516   : > { %1908 = vmatprep.subr.mxu1 %v3844_v32  ;;  %v4510_v32 = vld [vmem:[#allocation41_spill] sm:$0xff] }
 0x517   : > { %1909 = vmatpush1.msra.mxu1 %v3847_v33  ;;  %v4511_v33 = vld [vmem:[#allocation42_spill] sm:$0xff] }
 0x518   : > { %1910 = vmatprep.subr.mxu1 %v3850_v34  ;;  %v4512_v34 = vld [vmem:[#allocation43_spill] sm:$0xff] }
 0x519   : > { %1911 = vmatpush1.msra.mxu1 %v3853_v35  ;;  %v4513_v35 = vld [vmem:[#allocation44_spill] sm:$0xff] }
 0x51a   : > { %1912 = vmatprep.subr.mxu1 %v3856_v36  ;;  %v4514_v36 = vld [vmem:[#allocation45_spill] sm:$0xff] }
 0x51b   : > { %1913 = vmatpush1.msra.mxu1 %v3859_v37  ;;  %v4515_v37 = vld [vmem:[#allocation46_spill] sm:$0xff] }
 0x51c   : > { %1914 = vmatprep.subr.mxu1 %v3862_v38  ;;  %v4516_v38 = vld [vmem:[#allocation47_spill] sm:$0xff] }
 0x51d   : > { %1915 = vmatpush1.msra.mxu1 %v3865_v39  ;;  %v4517_v39 = vld [vmem:[#allocation48_spill] sm:$0xff] }
 0x51e   : > { %1916 = vmatprep.subr.mxu1 %v3868_v40  ;;  %v4518_v40 = vld [vmem:[#allocation49_spill] sm:$0xff] }
 0x51f   : > { %1917 = vmatpush1.msra.mxu1 %v3871_v41  ;;  %v4519_v41 = vld [vmem:[#allocation50_spill] sm:$0xff] }
 0x520   : > { %1918 = vmatprep.subr.mxu1 %v3874_v42  ;;  %v4520_v42 = vld [vmem:[#allocation51_spill] sm:$0xff] }
 0x521   : > { %1919 = vmatpush1.msra.mxu1 %v3877_v43  ;;  %v4521_v43 = vld [vmem:[#allocation52_spill] sm:$0xff] }
 0x522   : > { %1920 = vmatprep.subr.mxu1 %v3880_v44  ;;  %v4522_v44 = vld [vmem:[#allocation53_spill] sm:$0xff] }
 0x523   : > { %1921 = vmatpush1.msra.mxu1 %v3883_v45  ;;  %v4523_v45 = vld [vmem:[#allocation54_spill] sm:$0xff] }
 0x524   : > { %1922 = vmatprep.subr.mxu1 %v3886_v46  ;;  %v4524_v46 = vld [vmem:[#allocation55_spill] sm:$0xff] }
 0x525   : > { %1923 = vmatpush1.msra.mxu1 %v3889_v47  ;;  %v4525_v47 = vld [vmem:[#allocation56_spill] sm:$0xff] }
 0x526   : > { %1924 = vmatprep.subr.mxu1 %v3892_v48  ;;  %v4526_v48 = vld [vmem:[#allocation57_spill] sm:$0xff] }
 0x527   : > { %1925 = vmatpush1.msra.mxu1 %v3895_v49  ;;  %v4527_v49 = vld [vmem:[#allocation58_spill] sm:$0xff] }
 0x528   : > { %1959 = vmatmul.mubr.f32.vlgmr.msra.gmra.mxu1 %v4116_v58  ;;  %1965 = vmatprep.subr.mxu1 %v3898_v50  ;;  %v4528_v50 = vld [vmem:[#allocation59_spill] sm:$0xff] }
 0x529   : > { %1966 = vmatpush1.msra.mxu1 %v3901_v51  ;;  %v4529_v51 = vld [vmem:[#allocation60_spill] sm:$0xff] }
 0x52a   : > { %1967 = vmatprep.subr.mxu1 %v3904_v52  ;;  %v4530_v52 = vld [vmem:[#allocation61_spill] sm:$0xff] }
 0x52b   : > { %1968 = vmatpush1.msra.mxu1 %v3908_v53  ;;  %v4531_v53 = vld [vmem:[#allocation62_spill] sm:$0xff] }
 0x52c   : > { %1969 = vmatprep.subr.mxu1 %v3911_v54  ;;  %v4532_v54 = vld [vmem:[#allocation63_spill] sm:$0xff] }
 0x52d   : > { %1970 = vmatpush1.msra.mxu1 %v3915_v55  ;;  %v4533_v55 = vld [vmem:[#allocation64_spill] sm:$0xff] }
 0x52e   : > { %1971 = vmatprep.subr.mxu1 %v3918_v56  ;;  %v4534_v56 = vld [vmem:[#allocation65_spill] sm:$0xff] }
 0x52f   : > { %1972 = vmatpush1.msra.mxu1 %v3921_v57  ;;  %v4535_v57 = vld [vmem:[#allocation66_spill] sm:$0xff] }
 0x530   : > { %1973 = vmatprep.subr.mxu1 %v4496_v18  ;;  %v4224_v18 = vld [vmem:[%s609_s30] sm:$0xff] }
 0x531   : > { %1974 = vmatpush1.msra.mxu1 %v4497_v19  ;;  %v4226_v19 = vld [vmem:[%s609_s30 + $0x8] sm:$0xff] }
 0x532   : > { %1975 = vmatprep.subr.mxu1 %v4498_v20 }
 0x533   : > { %1976 = vmatpush1.msra.mxu1 %v4499_v21 }
 0x534   : > { %1977 = vmatprep.subr.mxu1 %v4500_v22 }
 0x535   : > { %1978 = vmatpush1.msra.mxu1 %v4501_v23 }
 0x536   : > { %1979 = vmatprep.subr.mxu1 %v4502_v24 }
 0x537   : > { %1980 = vmatpush1.msra.mxu1 %v4503_v25 }
 0x538   : > { %1981 = vmatprep.subr.mxu1 %v4504_v26 }
 0x539   : > { %1982 = vmatpush1.msra.mxu1 %v4505_v27 }
 0x53a   : > { %1983 = vmatprep.subr.mxu1 %v4506_v28 }
 0x53b   : > { %1984 = vmatpush1.msra.mxu1 %v4507_v29 }
 0x53c   : > { %1985 = vmatprep.subr.mxu1 %v4508_v30 }
 0x53d   : > { %1986 = vmatpush1.msra.mxu1 %v4509_v31 }
 0x53e   : > { %1987 = vmatprep.subr.mxu1 %v4510_v32 }
 0x53f   : > { %1988 = vmatpush1.msra.mxu1 %v4511_v33 }
 0x540   : > { %1989 = vmatprep.subr.mxu1 %v4512_v34 }
 0x541   : > { %1990 = vmatpush1.msra.mxu1 %v4513_v35 }
 0x542   : > { %1991 = vmatprep.subr.mxu1 %v4514_v36 }
 0x543   : > { %1992 = vmatpush1.msra.mxu1 %v4515_v37 }
 0x544   : > { %1993 = vmatprep.subr.mxu1 %v4516_v38 }
 0x545   : > { %1994 = vmatpush1.msra.mxu1 %v4517_v39 }
 0x546   : > { %1995 = vmatprep.subr.mxu1 %v4518_v40 }
 0x547   : > { %1996 = vmatpush1.msra.mxu1 %v4519_v41 }
 0x548   : > { %1997 = vmatprep.subr.mxu1 %v4520_v42  ;;  %v4552_v42 = vld [vmem:[#allocation26_spill] sm:$0xff] }
 0x549   : > { %1998 = vmatpush2.msra.mxu1 %v4521_v43  ;;  %v4553_v43 = vld [vmem:[#allocation25_spill] sm:$0xff] }
 0x54a   : > { %1999 = vmatprep.subr.mxu1 %v4522_v44 }
 0x54b   : > { %2000 = vmatpush2.msra.mxu1 %v4523_v45  ;;  %v3060_v45 = vld [vmem:[#allocation10 + $0x1e8] sm:$0xff] }
 0x54c   : > { %2001 = vmatprep.subr.mxu1 %v4524_v46  ;;  %v3061_v46 = vld [vmem:[#allocation10 + $0x1e0] sm:$0xff] }
 0x54d   : > { %2002 = vmatpush2.msra.mxu1 %v4525_v47  ;;  %v3062_v47 = vld [vmem:[#allocation10 + $0x1c8] sm:$0xff] }
 0x54e   : > { %2003 = vmatprep.subr.mxu1 %v4526_v48  ;;  %v3063_v48 = vld [vmem:[#allocation10 + $0x1c0] sm:$0xff] }
 0x54f   : > { %2004 = vmatpush2.msra.mxu1 %v4527_v49  ;;  %v3064_v49 = vld [vmem:[#allocation10 + $0x1a8] sm:$0xff] }
 0x550   : > { %2005 = vmatprep.subr.mxu1 %v4528_v50  ;;  %v3065_v50 = vld [vmem:[#allocation10 + $0x1a0] sm:$0xff] }
 0x551   : > { %2006 = vmatpush2.msra.mxu1 %v4529_v51  ;;  %v3066_v51 = vld [vmem:[#allocation10 + $0x188] sm:$0xff] }
 0x552   : > { %2007 = vmatprep.subr.mxu1 %v4530_v52  ;;  %v3067_v52 = vld [vmem:[#allocation10 + $0x180] sm:$0xff] }
 0x553   : > { %2008 = vmatpush2.msra.mxu1 %v4531_v53  ;;  %v3068_v53 = vld [vmem:[#allocation10 + $0x168] sm:$0xff] }
 0x554   : > { %2009 = vmatprep.subr.mxu1 %v4532_v54  ;;  %v3069_v54 = vld [vmem:[#allocation10 + $0x160] sm:$0xff] }
 0x555   : > { %2010 = vmatpush2.msra.mxu1 %v4533_v55  ;;  %v3070_v55 = vld [vmem:[#allocation10 + $0x148] sm:$0xff] }
 0x556   : > { %2011 = vmatprep.subr.mxu1 %v4534_v56  ;;  %v3071_v56 = vld [vmem:[#allocation10 + $0x140] sm:$0xff] }
 0x557   : > { %2012 = vmatpush2.msra.mxu1 %v4535_v57  ;;  %v3072_v57 = vld [vmem:[#allocation10 + $0x128] sm:$0xff] }
 0x558   : > { %2013 = vmatprep.subr.mxu1 %v4536_v10  ;;  %v3073_v10 = vld [vmem:[#allocation10 + $0x120] sm:$0xff] }
 0x559   : > { %2014 = vmatpush2.msra.mxu1 %v4537_v17  ;;  %v3074_v17 = vld [vmem:[#allocation10 + $0x108] sm:$0xff] }
 0x55a   : > { %2015 = vmatprep.subr.mxu1 %v4538_v16  ;;  %v3075_v16 = vld [vmem:[#allocation10 + $0x100] sm:$0xff] }
 0x55b   : > { %2016 = vmatpush2.msra.mxu1 %v4539_v2  ;;  %v3076_v2 = vld [vmem:[#allocation10 + $0xe8] sm:$0xff] }
 0x55c   : > { %2017 = vmatprep.subr.mxu1 %v4540_v1  ;;  %v3077_v1 = vld [vmem:[#allocation10 + $0xe0] sm:$0xff] }
 0x55d   : > { %2018 = vmatpush2.msra.mxu1 %v4541_v0  ;;  %v3078_v0 = vld [vmem:[#allocation10 + $0xc8] sm:$0xff] }
 0x55e   : > { %2019 = vmatprep.subr.mxu1 %v4542_v4  ;;  %v3079_v4 = vld [vmem:[#allocation10 + $0xc0] sm:$0xff] }
 0x55f   : > { %2020 = vmatpush2.msra.mxu1 %v4543_v8  ;;  %v3080_v8 = vld [vmem:[#allocation10 + $0xa8] sm:$0xff] }
 0x560   : > { %2021 = vmatprep.subr.mxu1 %v4544_v63  ;;  %v3081_v63 = vld [vmem:[#allocation10 + $0xa0] sm:$0xff] }
 0x561   : > { %2022 = vmatpush2.msra.mxu1 %v4545_v61  ;;  %v3082_v61 = vld [vmem:[#allocation10 + $0x88] sm:$0xff] }
 0x562   : > { %2023 = vmatprep.subr.mxu1 %v4546_v3  ;;  %v3083_v3 = vld [vmem:[#allocation10 + $0x80] sm:$0xff] }
 0x563   : > { %2024 = vmatpush2.msra.mxu1 %v4547_v62  ;;  %v3084_v62 = vld [vmem:[#allocation10 + $0x68] sm:$0xff] }
 0x564   : > { %2025 = vmatprep.subr.mxu1 %v4548_v14  ;;  %v3085_v14 = vld [vmem:[#allocation10 + $0x60] sm:$0xff] }
 0x565   : > { %2026 = vmatpush2.msra.mxu1 %v4549_v15  ;;  %v3086_v15 = vld [vmem:[#allocation10 + $0x48] sm:$0xff] }
 0x566   : > { %2027 = vmatprep.subr.mxu1 %v4550_v7  ;;  %v3087_v7 = vld [vmem:[#allocation10 + $0x40] sm:$0xff] }
 0x567   : > { %2028 = vmatpush2.msra.mxu1 %v4551_v5  ;;  %v3088_v5 = vld [vmem:[#allocation10 + $0x28] sm:$0xff] }
 0x5c8   : > { %v2877_v6 = vpop.f32.mrf.mxu1 }
 0x5c9   : > { %v1651_v22 = vmul.f32 %v2877_v6, %v4226_v19  ;;  %v3089_v6 = vld [vmem:[#allocation10 + $0x20] sm:$0xff] }
 0x5ca   : > { %v1641_v20 = vpop.f32.mrf.mxu1 }
 0x5cb   : > { %v1650_v21 = vmul.f32 %v1641_v20, %v4224_v18  ;;  %v1656_v24 = vsel %vm1652_vm2, %v1651_v22, 0.0  ;;  %v3090_v20 = vld [vmem:[#allocation10 + $0x8] sm:$0xff] }
 0x5cc   : > { %v3092_v22 = vld [vmem:[#allocation10 + $0x3e8] sm:$0xff] }
 0x5cd   : > { %v1653_v23 = vsel %vm1652_vm2, %v1650_v21, 0.0  ;;  %v3091_v21 = vld [vmem:[#allocation10] sm:$0xff] }
 0x5ce   : > { %1654 = vadd.xlane.f32.xlu1 %v1653_v23  ;;  %v3093_v23 = vld [vmem:[#allocation10 + $0x3e0] sm:$0xff] }
 0x5d2   : > { %1657 = vadd.xlane.f32.xlu1 %v1656_v24  ;;  %v3094_v24 = vld [vmem:[#allocation10 + $0x3c8] sm:$0xff] }
 0x657   : > { %v1655_v25 = vpop.xlane.xlu1 %1654 }
 0x65b   : > { %v1658_v26 = vpop.xlane.xlu1 %1657 }
 0x65c   : > { %v1659_v27 = vmax.f32 %v1655_v25, %v1658_v26 }
 0x65e   : > { %v1660_v28 = vrot.slane %v1659_v27, 4 }
 0x660   : > { %v1661_v29 = vmax.f32 %v1659_v27, %v1660_v28  ;;  %v3097_v27 = vld [vmem:[#allocation10 + $0x3a0] sm:$0xff]  ;;  %v3098_v28 = vld [vmem:[#allocation10 + $0x388] sm:$0xff] }
 0x662   : > { %v1662_v30 = vrot.slane %v1661_v29, 2 }
 0x664   : > { %v1663_v31 = vmax.f32 %v1661_v29, %v1662_v30  ;;  %v3099_v29 = vld [vmem:[#allocation10 + $0x380] sm:$0xff]  ;;  %v3100_v30 = vld [vmem:[#allocation10 + $0x368] sm:$0xff] }
 0x666   : > { %v1664_v32 = vrot.slane %v1663_v31, 1 }
 0x668   : > { %v1665_v33 = vmax.f32 %v1663_v31, %v1664_v32  ;;  %v3101_v31 = vld [vmem:[#allocation10 + $0x360] sm:$0xff]  ;;  %v3102_v32 = vld [vmem:[#allocation10 + $0x348] sm:$0xff] }
 0x66a   : > { %2911 = vpush %v1665_v33  ;;  %v3103_v33 = vld [vmem:[#allocation10 + $0x340] sm:$0xff] }
 0x69b   : > { %s2912_s16 = spop %2911 }
 0x69c   : > { %v1667_v34 = vstv %s2912_s16 }
 0x69d   : > { %v1668_v35 = vsub.f32 %v1655_v25, %v1667_v34  ;;  %v1669_v36 = vsub.f32 %v1658_v26, %v1667_v34  ;;  %v3095_v25 = vld [vmem:[#allocation10 + $0x3c0] sm:$0xff]  ;;  %v3096_v26 = vld [vmem:[#allocation10 + $0x3a8] sm:$0xff] }
 0x69e   : > { %v3104_v34 = vld [vmem:[#allocation10 + $0x328] sm:$0xff] }
 0x69f   : > { %v1672_v37 = vmul.f32 1.442695, %v1669_v36  ;;  %v1670_v38 = vmul.f32 1.442695, %v1668_v35  ;;  %v3105_v35 = vld [vmem:[#allocation10 + $0x320] sm:$0xff]  ;;  %v3106_v36 = vld [vmem:[#allocation10 + $0x308] sm:$0xff] }
 0x6a1   : > { %3032 = vpow2.f32 %v1672_v37  ;;  %v3107_v37 = vld [vmem:[#allocation10 + $0x300] sm:$0xff] }
 0x6a2   : > { %3034 = vpow2.f32 %v1670_v38  ;;  %v3108_v38 = vld [vmem:[#allocation10 + $0x2e8] sm:$0xff] }
 0x6ae   : > { %v3033_v39 = vpop.eup %3032 }
 0x6af   : > { %2879 = vmatpush3.msra.mxu0 %v3033_v39  ;;  %v3035_v40 = vpop.eup %3034  ;;  %v1745_v41 = vmul.f32 %v3033_v39, %v3791_v13  ;;  %v3109_v39 = vld [vmem:[#allocation10 + $0x2e0] sm:$0xff] }
 0x6b0   : > { %2880 = vmatprep.subr.mxu0 %v4493_v12  ;;  %v1744_v44 = vmul.f32 %v3035_v40, %v4553_v43 }
 0x6b1   : > { %2881 = vmatpush3.msra.mxu0 %v3035_v40  ;;  %v3110_v40 = vld [vmem:[#allocation10 + $0x2c8] sm:$0xff] }
 0x6b2   : > { %2883 = vmatmul.mubr.msk.f32.vlgmr.msra.gmra.mxu0 %vm619_vm0, %v4552_v42  ;;  %2885 = vmatprep.subr.mxu0 %v4493_v12 }
 0x6b3   : > { %2886 = vmatpush3.msra.mxu0 %v1745_v41  ;;  %2889 = vmatprep.mubr.msk.f32.mxu0 %vm3411_vm1, %v4493_v12  ;;  %v3111_v41 = vld [vmem:[#allocation10 + $0x2c0] sm:$0xff] }
 0x6b4   : > { %2887 = vmatprep.subr.mxu0 %v4493_v12 }
 0x6b5   : > { %2888 = vmatpush3.msra.mxu0 %v1744_v44  ;;  %v3113_v44 = vld [vmem:[#allocation10 + $0x2a0] sm:$0xff] }
 0x6b6   : > { %2890 = vmatmul.mubr.msk.f32.vlgmr.msra.gmra.mxu0 %vm619_vm0, %v4552_v42  ;;  %1823 = vmatprep.subr.mxu0 %v3060_v45  ;;  %v3112_v42 = vld [vmem:[#allocation10 + $0x2a8] sm:$0xff] }
 0x6b7   : > { %1824 = vmatpush1.msra.mxu0 %v3061_v46  ;;  %v3114_v45 = vld [vmem:[#allocation10 + $0x288] sm:$0xff]  ;;  %v3115_v46 = vld [vmem:[#allocation10 + $0x280] sm:$0xff] }
 0x6b8   : > { %1825 = vmatprep.subr.mxu0 %v3062_v47  ;;  %v3116_v47 = vld [vmem:[#allocation10 + $0x268] sm:$0xff] }
 0x6b9   : > { %1826 = vmatpush1.msra.mxu0 %v3063_v48  ;;  %v3117_v48 = vld [vmem:[#allocation10 + $0x260] sm:$0xff] }
 0x6ba   : > { %1827 = vmatprep.subr.mxu0 %v3064_v49  ;;  %v3118_v49 = vld [vmem:[#allocation10 + $0x248] sm:$0xff] }
 0x6bb   : > { %1828 = vmatpush1.msra.mxu0 %v3065_v50  ;;  %v3119_v50 = vld [vmem:[#allocation10 + $0x240] sm:$0xff] }
 0x6bc   : > { %1829 = vmatprep.subr.mxu0 %v3066_v51  ;;  %v3120_v51 = vld [vmem:[#allocation10 + $0x228] sm:$0xff] }
 0x6bd   : > { %1830 = vmatpush1.msra.mxu0 %v3067_v52  ;;  %v3121_v52 = vld [vmem:[#allocation10 + $0x220] sm:$0xff] }
 0x6be   : > { %1831 = vmatprep.subr.mxu0 %v3068_v53  ;;  %v3122_v53 = vld [vmem:[#allocation10 + $0x208] sm:$0xff] }
 0x6bf   : > { %1832 = vmatpush1.msra.mxu0 %v3069_v54  ;;  %v3123_v54 = vld [vmem:[#allocation10 + $0x200] sm:$0xff] }
 0x6c0   : > { %1833 = vmatprep.subr.mxu0 %v3070_v55  ;;  %v3124_v55 = vld [vmem:[#allocation10 + $0x5f8] sm:$0xff] }
 0x6c1   : > { %1834 = vmatpush1.msra.mxu0 %v3071_v56 }
 0x6c2   : > { %1835 = vmatprep.subr.mxu0 %v3072_v57 }
 0x6c3   : > { %1836 = vmatpush1.msra.mxu0 %v3073_v10 }
 0x6c4   : > { %1837 = vmatprep.subr.mxu0 %v3074_v17 }
 0x6c5   : > { %1838 = vmatpush1.msra.mxu0 %v3075_v16 }
 0x6c6   : > { %1839 = vmatprep.subr.mxu0 %v3076_v2 }
 0x6c7   : > { %1840 = vmatpush1.msra.mxu0 %v3077_v1 }
 0x6c8   : > { %1841 = vmatprep.subr.mxu0 %v3078_v0  ;;  %v3125_v0 = vld [vmem:[#allocation10 + $0x5f0] sm:$0xff] }
 0x6c9   : > { %1842 = vmatpush1.msra.mxu0 %v3079_v4  ;;  %v3126_v4 = vld [vmem:[#allocation10 + $0x5d8] sm:$0xff] }
 0x6ca   : > { %1843 = vmatprep.subr.mxu0 %v3080_v8  ;;  %v3127_v8 = vld [vmem:[#allocation10 + $0x5d0] sm:$0xff] }
 0x6cb   : > { %1844 = vmatpush1.msra.mxu0 %v3081_v63  ;;  %v3128_v63 = vld [vmem:[#allocation10 + $0x5b8] sm:$0xff] }
 0x6cc   : > { %1845 = vmatprep.subr.mxu0 %v3082_v61  ;;  %v3129_v61 = vld [vmem:[#allocation10 + $0x5b0] sm:$0xff] }
 0x6cd   : > { %1846 = vmatpush1.msra.mxu0 %v3083_v3  ;;  %v3130_v3 = vld [vmem:[#allocation10 + $0x598] sm:$0xff] }
 0x6ce   : > { %1847 = vmatprep.subr.mxu0 %v3084_v62  ;;  %v3131_v62 = vld [vmem:[#allocation10 + $0x590] sm:$0xff] }
 0x6cf   : > { %1848 = vmatpush1.msra.mxu0 %v3085_v14  ;;  %v3132_v14 = vld [vmem:[#allocation10 + $0x578] sm:$0xff] }
 0x6d0   : > { %1849 = vmatprep.subr.mxu0 %v3086_v15  ;;  %v3133_v15 = vld [vmem:[#allocation10 + $0x570] sm:$0xff] }
 0x6d1   : > { %1850 = vmatpush1.msra.mxu0 %v3087_v7  ;;  %v3134_v7 = vld [vmem:[#allocation10 + $0x558] sm:$0xff] }
 0x6d2   : > { %1851 = vmatprep.subr.mxu0 %v3088_v5  ;;  %v3135_v5 = vld [vmem:[#allocation10 + $0x550] sm:$0xff] }
 0x6d3   : > { %1852 = vmatpush1.msra.mxu0 %v3089_v6  ;;  %v3136_v6 = vld [vmem:[#allocation10 + $0x538] sm:$0xff] }
 0x6d4   : > { %1853 = vmatprep.subr.mxu0 %v3090_v20  ;;  %v3137_v20 = vld [vmem:[#allocation10 + $0x530] sm:$0xff] }
 0x6d5   : > { %1854 = vmatpush1.msra.mxu0 %v3091_v21  ;;  %v3138_v21 = vld [vmem:[#allocation10 + $0x518] sm:$0xff] }
 0x6d6   : > { %1855 = vmatprep.subr.mxu0 %v3092_v22  ;;  %v3139_v22 = vld [vmem:[#allocation10 + $0x510] sm:$0xff] }
 0x6d7   : > { %1856 = vmatpush2.msra.mxu0 %v3093_v23  ;;  %v3140_v23 = vld [vmem:[#allocation10 + $0x4f8] sm:$0xff] }
 0x6d8   : > { %1857 = vmatprep.subr.mxu0 %v3094_v24  ;;  %v3141_v24 = vld [vmem:[#allocation10 + $0x4f0] sm:$0xff] }
 0x6d9   : > { %1858 = vmatpush2.msra.mxu0 %v3095_v25  ;;  %v3142_v25 = vld [vmem:[#allocation10 + $0x4d8] sm:$0xff] }
 0x6da   : > { %1859 = vmatprep.subr.mxu0 %v3096_v26  ;;  %v3143_v26 = vld [vmem:[#allocation10 + $0x4d0] sm:$0xff] }
 0x6db   : > { %1860 = vmatpush2.msra.mxu0 %v3097_v27  ;;  %v3144_v27 = vld [vmem:[#allocation10 + $0x4b8] sm:$0xff] }
 0x6dc   : > { %1861 = vmatprep.subr.mxu0 %v3098_v28  ;;  %v3145_v28 = vld [vmem:[#allocation10 + $0x4b0] sm:$0xff] }
 0x6dd   : > { %1862 = vmatpush2.msra.mxu0 %v3099_v29  ;;  %v3146_v29 = vld [vmem:[#allocation10 + $0x498] sm:$0xff] }
 0x6de   : > { %1863 = vmatprep.subr.mxu0 %v3100_v30  ;;  %v3147_v30 = vld [vmem:[#allocation10 + $0x490] sm:$0xff] }
 0x6df   : > { %1864 = vmatpush2.msra.mxu0 %v3101_v31  ;;  %v3148_v31 = vld [vmem:[#allocation10 + $0x478] sm:$0xff] }
 0x6e0   : > { %1865 = vmatprep.subr.mxu0 %v3102_v32  ;;  %v3149_v32 = vld [vmem:[#allocation10 + $0x470] sm:$0xff] }
 0x6e1   : > { %1866 = vmatpush2.msra.mxu0 %v3103_v33  ;;  %v3150_v33 = vld [vmem:[#allocation10 + $0x458] sm:$0xff] }
 0x6e2   : > { %1867 = vmatprep.subr.mxu0 %v3104_v34  ;;  %v3151_v34 = vld [vmem:[#allocation10 + $0x450] sm:$0xff] }
 0x6e3   : > { %1868 = vmatpush2.msra.mxu0 %v3105_v35  ;;  %v3152_v35 = vld [vmem:[#allocation10 + $0x438] sm:$0xff] }
 0x6e4   : > { %1869 = vmatprep.subr.mxu0 %v3106_v36  ;;  %v3153_v36 = vld [vmem:[#allocation10 + $0x430] sm:$0xff] }
 0x6e5   : > { %1870 = vmatpush2.msra.mxu0 %v3107_v37  ;;  %v3154_v37 = vld [vmem:[#allocation10 + $0x418] sm:$0xff] }
 0x6e6   : > { %1871 = vmatprep.subr.mxu0 %v3108_v38  ;;  %v3155_v38 = vld [vmem:[#allocation10 + $0x410] sm:$0xff] }
 0x6e7   : > { %1872 = vmatpush2.msra.mxu0 %v3109_v39  ;;  %v1960_v39 = vpop.f32.mrf.mxu1 }
 0x6e8   : > { %1873 = vmatprep.subr.mxu0 %v3110_v40 }
 0x6e9   : > { %1874 = vmatpush2.msra.mxu0 %v3111_v41 }
 0x6ea   : > { %1875 = vmatprep.subr.mxu0 %v3112_v42 }
 0x6eb   : > { %1876 = vmatpush2.msra.mxu0 %v3113_v44  ;;  %v4554_v44 = vld [vmem:[#allocation84_spill] sm:$0xff] }
 0x6ec   : > { %1877 = vmatprep.subr.mxu0 %v3114_v45 }
 0x6ed   : > { %1878 = vmatpush2.msra.mxu0 %v3115_v46  ;;  %v1962_v46 = vpop.f32.mrf.mxu1 }
 0x6ee   : > { %1879 = vmatprep.subr.mxu0 %v3116_v47 }
 0x6ef   : > { %1880 = vmatpush2.msra.mxu0 %v3117_v48 }
 0x6f0   : > { %1881 = vmatprep.subr.mxu0 %v3118_v49 }
 0x6f1   : > { %1882 = vmatpush2.msra.mxu0 %v3119_v50 }
 0x6f2   : > { %1883 = vmatprep.subr.mxu0 %v3120_v51 }
 0x6f3   : > { %1884 = vmatpush2.msra.mxu0 %v3121_v52 }
 0x6f4   : > { %1885 = vmatprep.subr.mxu0 %v3122_v53 }
 0x6f5   : > { %1886 = vmatpush2.msra.mxu0 %v3123_v54 }
 0x6f6   : > { %2036 = vmatprep.subr.mxu0 %v3124_v55 }
 0x772   : > { %v1740_v56 = vpop.f32.mrf.mxu0 }
 0x773   : > { %3036 = vrcp.f32 %v1740_v56 }
 0x774   : > { %v2884_v57 = vpop.f32.mrf.mxu0 }
 0x776   : > { %v1812_v10 = vpop.f32.mrf.mxu0 }
 0x778   : > { %v2891_v17 = vpop.f32.mrf.mxu0 }
 0x780   : > { %v3037_v16 = vpop.eup %3036 }
 0x781   : > { %1819 = vperm.xlu0 %3014, %v3037_v16  }
 0x7fc   : > { %v1820_v2 = vpop.permute.xlu0 %1819 }
 0x7fd   : > { %v1822_v1 = vmul.f32 %v1820_v2, %v1812_v10 }
 0x7ff   : > { %1887 = vmatprep.mubr.f32.mxu0 %v1822_v1  ;;  %2029 = vmatprep.mubr.f32.mxu1 %v1822_v1 }
 0x800   : > { %1888 = vmatmul.mubr.f32.vlgmr.msra.gmra.mxu0 %v4116_v58  ;;  %2030 = vmatmul.mubr.f32.vlgmr.msra.gmra.mxu1 %v4116_v58 }
 0x801   : > { %2037 = vmatpush1.msra.mxu0 %v3125_v0  ;;  %2100 = vmatprep.mubr.f32.mxu0 %v4493_v12 }
 0x802   : > { %2038 = vmatprep.subr.mxu0 %v3126_v4 }
 0x803   : > { %2039 = vmatpush1.msra.mxu0 %v3127_v8 }
 0x804   : > { %2040 = vmatprep.subr.mxu0 %v3128_v63 }
 0x805   : > { %2041 = vmatpush1.msra.mxu0 %v3129_v61 }
 0x806   : > { %2042 = vmatprep.subr.mxu0 %v3130_v3 }
 0x807   : > { %2043 = vmatpush1.msra.mxu0 %v3131_v62 }
 0x808   : > { %2044 = vmatprep.subr.mxu0 %v3132_v14 }
 0x809   : > { %2045 = vmatpush1.msra.mxu0 %v3133_v15 }
 0x80a   : > { %2046 = vmatprep.subr.mxu0 %v3134_v7 }
 0x80b   : > { %2047 = vmatpush1.msra.mxu0 %v3135_v5 }
 0x80c   : > { %2048 = vmatprep.subr.mxu0 %v3136_v6 }
 0x80d   : > { %2049 = vmatpush1.msra.mxu0 %v3137_v20 }
 0x80e   : > { %2050 = vmatprep.subr.mxu0 %v3138_v21 }
 0x80f   : > { %2051 = vmatpush1.msra.mxu0 %v3139_v22 }
 0x810   : > { %2052 = vmatprep.subr.mxu0 %v3140_v23 }
 0x811   : > { %2053 = vmatpush1.msra.mxu0 %v3141_v24 }
 0x812   : > { %2054 = vmatprep.subr.mxu0 %v3142_v25 }
 0x813   : > { %2055 = vmatpush1.msra.mxu0 %v3143_v26 }
 0x814   : > { %2056 = vmatprep.subr.mxu0 %v3144_v27 }
 0x815   : > { %2057 = vmatpush1.msra.mxu0 %v3145_v28 }
 0x816   : > { %2058 = vmatprep.subr.mxu0 %v3146_v29 }
 0x817   : > { %2059 = vmatpush1.msra.mxu0 %v3147_v30 }
 0x818   : > { %2060 = vmatprep.subr.mxu0 %v3148_v31 }
 0x819   : > { %2061 = vmatpush1.msra.mxu0 %v3149_v32 }
 0x81a   : > { %2062 = vmatprep.subr.mxu0 %v3150_v33 }
 0x81b   : > { %2063 = vmatpush1.msra.mxu0 %v3151_v34 }
 0x81c   : > { %2064 = vmatprep.subr.mxu0 %v3152_v35 }
 0x81d   : > { %2065 = vmatpush1.msra.mxu0 %v3153_v36  ;;  %v3156_v36 = vld [vmem:[%s3789_s9] sm:$0x3]  ;;  %s2490_s9 = scalar_lea.sflag [#allocation4], %s3680_s0 }
 0x81e   : > { %2066 = vmatprep.subr.mxu0 %v3154_v37 }
 0x81f   : > { %2067 = vmatpush1.msra.mxu0 %v3155_v38  ;;  %v2409_v38 = vld [vmem:[#allocation11 + $0xf8] sm:$0xff] }
 0x820   : > { %2101 = vmatmul.mubr.f32.vlgmr.msra.gmra.mxu0 %v4116_v58 }
 0x821   : > { %2894 = vmatprep.mubr.f32.mxu0 %v4553_v43 }
 0x8c0   : > { %v1889_v40 = vpop.f32.mrf.mxu0  ;;  %v2031_v52 = vpop.f32.mrf.mxu1 }
 0x8c1   : > { %v1890_v41 = vadd.f32 %v1889_v40, %v4103_v9  ;;  %v2032_v56 = vadd.f32 %v2031_v52, %v4107_v60  ;;  %v2408_v40 = vld [vmem:[#allocation11 + $0xf0] sm:$0xff]  ;;  %v2401_v52 = vld [vmem:[#allocation11 + $0xb8] sm:$0xff] }
 0x8c2   : > { %v1891_v42 = vpop.f32.mrf.mxu0  ;;  %v2033_v55 = vpop.f32.mrf.mxu1 }
 0x8c3   : > { %v1892_v45 = vadd.f32 %v1891_v42, %v4554_v44  ;;  %v1961_v48 = vadd.f32 %v1960_v39, %v1890_v41  ;;  %v2034_v9 = vadd.f32 %v2033_v55, %v4109_v59  ;;  %v2393_v39 = vld [vmem:[#allocation11 + $0x78] sm:$0xff]  ;;  %v2407_v41 = vld [vmem:[#allocation11 + $0xe8] sm:$0xff]  ;;  %v2406_v44 = vld [vmem:[#allocation11 + $0xe0] sm:$0xff] }
 0x8c4   : > { %v2391_v42 = vld [vmem:[#allocation11 + $0x68] sm:$0xff] }
 0x8c5   : > { %v1963_v47 = vadd.f32 %v1962_v46, %v1892_v45  ;;  %v2710_v50 = vmul.f32 -1.442695, %v1961_v48  ;;  %v2405_v45 = vld [vmem:[#allocation11 + $0xd8] sm:$0xff]  ;;  %v2404_v46 = vld [vmem:[#allocation11 + $0xd0] sm:$0xff]  ;;  %v2403_v48 = vld [vmem:[#allocation11 + $0xc8] sm:$0xff] }
 0x8c6   : > { %v2399_v55 = vld [vmem:[#allocation11 + $0xa8] sm:$0xff] }
 0x8c7   : > { %v2711_v49 = vmul.f32 -1.442695, %v1963_v47  ;;  %v2388_v47 = vld [vmem:[#allocation11 + $0x50] sm:$0xff] }
 0x8c9   : > { %3038 = vpow2.f32 %v2711_v49  ;;  %v2387_v49 = vld [vmem:[#allocation11 + $0x48] sm:$0xff] }
 0x8ca   : > { %3040 = vpow2.f32 %v2710_v50  ;;  %v2402_v50 = vld [vmem:[#allocation11 + $0xc0] sm:$0xff] }
 0x8d6   : > { %v3039_v51 = vpop.eup %3038 }
 0x8d7   : > { %v3041_v53 = vpop.eup %3040  ;;  %v2116_v58 = vadd.f32 1.0, %v3039_v51  ;;  %v2386_v51 = vld [vmem:[#allocation11 + $0x40] sm:$0xff] }
 0x8d8   : > { %v2110_v54 = vadd.f32 1.0, %v3041_v53  ;;  %v2385_v53 = vld [vmem:[#allocation11 + $0x38] sm:$0xff] }
 0x8d9   : > { %3042 = vrcp.f32 %v2116_v58  ;;  %v2400_v58 = vld [vmem:[#allocation11 + $0xb0] sm:$0xff] }
 0x8da   : > { %3044 = vrcp.f32 %v2110_v54  ;;  %v2384_v54 = vld [vmem:[#allocation11 + $0x30] sm:$0xff] }
 0x8e0   : > { %v2102_v57 = vpop.f32.mrf.mxu0 }
 0x8e1   : > { %v2103_v10 = vadd.f32 %v2102_v57, %v2032_v56  ;;  %v2383_v56 = vld [vmem:[#allocation11 + $0x28] sm:$0xff]  ;;  %v2398_v57 = vld [vmem:[#allocation11 + $0xa0] sm:$0xff] }
 0x8e2   : > { %v2104_v17 = vpop.f32.mrf.mxu0 }
 0x8e3   : > { %3046 = vtanh.f32 %v2103_v10  ;;  %v2105_v16 = vadd.f32 %v2104_v17, %v2034_v9  ;;  %v2382_v9 = vld [vmem:[#allocation11 + $0x20] sm:$0xff]  ;;  %v2397_v10 = vld [vmem:[#allocation11 + $0x98] sm:$0xff] }
 0x8e4   : > { %v2381_v17 = vld [vmem:[#allocation11 + $0x18] sm:$0xff] }
 0x8e5   : > { %v2712_v2 = vmul.f32 -1.442695, %v2105_v16  ;;  %v2396_v16 = vld [vmem:[#allocation11 + $0x90] sm:$0xff] }
 0x8e6   : > { %v3043_v1 = vpop.eup %3042 }
 0x8e7   : > { %3048 = vpow2.f32 %v2712_v2  ;;  %v3045_v0 = vpop.eup %3044  ;;  %v2126_v8 = vmul.f32 %v3043_v1, %v4113_v11  ;;  %v2380_v2 = vld [vmem:[#allocation11 + $0x10] sm:$0xff]  ;;  %v2395_v1 = vld [vmem:[#allocation11 + $0x88] sm:$0xff] }
 0x8f0   : > { %v3047_v4 = vpop.eup %3046 }
 0x8f1   : > { %v2127_v63 = vmul.f32 %v3047_v4, %v3045_v0 }
 0x8f3   : > { %v2128_v61 = vadd.f32 %v2127_v63, %v2126_v8 }
 0x8f4   : > { %v3049_v3 = vpop.eup %3048 }
 0x8f5   : > { %v2123_v60 = vadd.f32 1.0, %v3049_v3  ;;  %3050 = vtanh.f32 %v2128_v61  ;;  %v2379_v61 = vld [vmem:[#allocation11 + $0x8] sm:$0xff]  ;;  %v2394_v3 = vld [vmem:[#allocation11 + $0x80] sm:$0xff] }
 0x8f7   : > { %3052 = vrcp.f32 %v2123_v60  ;;  %v2378_v60 = vld [vmem:[#allocation11] sm:$0xff] }
 0x902   : > { %v3051_v62 = vpop.eup %3050 }
 0x904   : > { %v3053_v59 = vpop.eup %3052 }
 0x905   : > { %v4253_v14 = vmul.f32 %v3053_v59, %v3051_v62 }
 0x907   : > { %2892 = vmatprep.subr.mxu0 %v4253_v14 }
 0x908   : > { %2893 = vmatpush3.xpose.msra.mxu0 %v4253_v14 }
 0x909   : > { %2897 = vmatprep.subr.mxu0 %v4493_v12 }
 0x90b   : > { %2895 = vmatmul.mubr.f32.vlgmr.msra.gmra.mxu0 %v3791_v13 }
 0x90c   : > { %2901 = vmatprep.mubr.msk.f32.mxu0 %vm3411_vm1, %v4493_v12 }
 0x9cb   : > { %v2896_v11 = vpop.f32.mrf.mxu0 }
 0x9cc   : > { %v2207_v15 = vmul.f32 %v2896_v11, %v4226_v19 }
 0x9cd   : > { %v2197_v7 = vpop.f32.mrf.mxu0 }
 0x9ce   : > { %v2206_v5 = vmul.f32 %v2197_v7, %v4224_v18  ;;  %v2211_v6 = vsel %vm1652_vm2, %v2207_v15, 0.0  ;;  %v2715_v7 = vld [vmem:[%s4327_s12] ss:$0 sm:$0xff] }
 0x9cf   : > { %2212 = vadd.xlane.f32.xlu0 %v2211_v6 }
 0x9d0   : > { %v2208_v20 = vsel %vm1652_vm2, %v2206_v5, 0.0 }
 0x9d1   : > { %2209 = vadd.xlane.f32.xlu1 %v2208_v20 }
 0xa58   : > { %v2213_v21 = vpop.xlane.xlu0 %2212 }
 0xa5a   : > { %v2210_v22 = vpop.xlane.xlu1 %2209 }
 0xa5b   : > { %v2214_v23 = vmax.f32 %v2210_v22, %v2213_v21 }
 0xa5d   : > { %v2215_v24 = vrot.slane %v2214_v23, 4 }
 0xa5f   : > { %v2216_v25 = vmax.f32 %v2214_v23, %v2215_v24 }
 0xa61   : > { %v2217_v26 = vrot.slane %v2216_v25, 2 }
 0xa63   : > { %v2218_v27 = vmax.f32 %v2216_v25, %v2217_v26 }
 0xa65   : > { %v2219_v28 = vrot.slane %v2218_v27, 1 }
 0xa67   : > { %v2220_v29 = vmax.f32 %v2218_v27, %v2219_v28 }
 0xa69   : > { %2913 = vpush %v2220_v29 }
 0xa9a   : > { %s2914_s14 = spop %2913 }
 0xa9b   : > { %v2222_v19 = vstv %s2914_s14 }
 0xa9c   : > { %v2223_v18 = vsub.f32 %v2210_v22, %v2222_v19  ;;  %v2224_v30 = vsub.f32 %v2213_v21, %v2222_v19  ;;  %v4555_v21 = vld [vmem:[#allocation83_spill] sm:$0xff] }
 0xa9e   : > { %v2227_v31 = vmul.f32 1.442695, %v2224_v30  ;;  %v2225_v32 = vmul.f32 1.442695, %v2223_v18 }
 0xaa0   : > { %3054 = vpow2.f32 %v2227_v31 }
 0xaa1   : > { %3056 = vpow2.f32 %v2225_v32 }
 0xaad   : > { %v3055_v33 = vpop.eup %3054 }
 0xaae   : > { %2898 = vmatpush3.msra.mxu0 %v3055_v33  ;;  %v3057_v34 = vpop.eup %3056  ;;  %v2300_v35 = vmul.f32 %v3055_v33, %v3791_v13  ;;  %v2392_v13 = vld [vmem:[#allocation11 + $0x70] sm:$0xff] }
 0xaaf   : > { %2899 = vmatprep.subr.mxu0 %v4493_v12  ;;  %v2299_v37 = vmul.f32 %v3057_v34, %v4553_v43  ;;  %v2390_v43 = vld [vmem:[#allocation11 + $0x60] sm:$0xff] }
 0xab0   : > { %2900 = vmatpush3.msra.mxu0 %v3057_v34 }
 0xab1   : > { %2902 = vmatmul.mubr.msk.f32.vlgmr.msra.gmra.mxu0 %vm619_vm0, %v3156_v36  ;;  %2904 = vmatprep.subr.mxu0 %v4493_v12 }
 0xab2   : > { %2905 = vmatpush3.msra.mxu0 %v2300_v35  ;;  %2908 = vmatprep.mubr.msk.f32.mxu0 %vm3411_vm1, %v4493_v12 }
 0xab3   : > { %2906 = vmatprep.subr.mxu0 %v4493_v12  ;;  %v2389_v12 = vld [vmem:[#allocation11 + $0x58] sm:$0xff] }
 0xab4   : > { %2907 = vmatpush3.msra.mxu0 %v2299_v37 }
 0xab5   : > { %2909 = vmatmul.mubr.msk.f32.vlgmr.msra.gmra.mxu0 %vm619_vm0, %v3156_v36  ;;  %2775 = vmatprep.subr.mxu0 %v2409_v38 }
 0xab6   : > { %2776 = vmatpush3.msra.mxu0 %v2393_v39 }
 0xab7   : > { %2777 = vmatprep.subr.mxu0 %v2408_v40 }
 0xab8   : > { %2778 = vmatpush3.msra.mxu0 %v2392_v13 }
 0xab9   : > { %2779 = vmatprep.subr.mxu0 %v2407_v41 }
 0xaba   : > { %2780 = vmatpush3.msra.mxu0 %v2391_v42 }
 0xabb   : > { %2781 = vmatprep.subr.mxu0 %v2406_v44 }
 0xabc   : > { %2782 = vmatpush3.msra.mxu0 %v2390_v43 }
 0xabd   : > { %2783 = vmatprep.subr.mxu0 %v2405_v45 }
 0xabe   : > { %2784 = vmatpush3.msra.mxu0 %v2389_v12 }
 0xabf   : > { %2785 = vmatprep.subr.mxu0 %v2404_v46 }
 0xac0   : > { %2786 = vmatpush3.msra.mxu0 %v2388_v47 }
 0xac1   : > { %2787 = vmatprep.subr.mxu0 %v2403_v48 }
 0xac2   : > { %2788 = vmatpush3.msra.mxu0 %v2387_v49 }
 0xac3   : > { %2789 = vmatprep.subr.mxu0 %v2402_v50 }
 0xac4   : > { %2790 = vmatpush3.msra.mxu0 %v2386_v51 }
 0xac5   : > { %2791 = vmatprep.subr.mxu0 %v2401_v52 }
 0xac6   : > { %2792 = vmatpush3.msra.mxu0 %v2385_v53 }
 0xac7   : > { %2793 = vmatprep.subr.mxu0 %v2400_v58 }
 0xac8   : > { %2794 = vmatpush3.msra.mxu0 %v2384_v54 }
 0xac9   : > { %2795 = vmatprep.subr.mxu0 %v2399_v55 }
 0xaca   : > { %2796 = vmatpush3.msra.mxu0 %v2383_v56 }
 0xacb   : > { %2797 = vmatprep.subr.mxu0 %v2398_v57 }
 0xacc   : > { %2798 = vmatpush3.msra.mxu0 %v2382_v9 }
 0xacd   : > { %2799 = vmatprep.subr.mxu0 %v2397_v10 }
 0xace   : > { %2800 = vmatpush3.msra.mxu0 %v2381_v17 }
 0xacf   : > { %2801 = vmatprep.subr.mxu0 %v2396_v16 }
 0xad0   : > { %2802 = vmatpush3.msra.mxu0 %v2380_v2 }
 0xad1   : > { %2803 = vmatprep.subr.mxu0 %v2395_v1 }
 0xad2   : > { %2804 = vmatpush3.msra.mxu0 %v2379_v61 }
 0xad3   : > { %2805 = vmatprep.subr.mxu0 %v2394_v3 }
 0xad4   : > { %2806 = vmatpush3.msra.mxu0 %v2378_v60 }
 0xb71   : > { %v2295_v0 = vpop.f32.mrf.mxu0 }
 0xb72   : > { %3058 = vrcp.f32 %v2295_v0 }
 0xb73   : > { %v2903_v4 = vpop.f32.mrf.mxu0 }
 0xb75   : > { %v2367_v8 = vpop.f32.mrf.mxu0 }
 0xb77   : > { %v2910_v63 = vpop.f32.mrf.mxu0 }
 0xb7f   : > { %v3059_v62 = vpop.eup %3058 }
 0xb80   : > { %2374 = vperm.xlu1 %3015, %v3059_v62  }
 0xbfb   : > { %v2375_v59 = vpop.permute.xlu1 %2374 }
 0xbfc   : > { %v2377_v11 = vmul.f32 %v2375_v59, %v2367_v8 }
 0xbfe   : > { %2481 = vmatprep.mubr.f32.mxu0 %v2377_v11 }
 0xbff   : > { %2482 = vmatmul.mubr.f32.vlgmr.msra.gmra.mxu0 %v4253_v14 }
 0xcbf   : > { %v2807_v15 = vpop.f32.mrf.mxu0 }
 0xcc1   : > { %v2808_v5 = vpop.f32.mrf.mxu0 }
 0xcc2   : > { %v2809_v6 = vadd.f32 %v2808_v5, %v2807_v15 }
 0xcc4   : > { %v2484_v20 = vadd.f32 %v2809_v6, %v2715_v7 }
 0xcc6   : > { %v2487_v22 = vadd.f32 %v2484_v20, %v4555_v21 }
 0xcc8   : > { %2488 = vst [vmem:[%s595_s15] sm:$0x3] %v2487_v22 }
 0xcc9   : > { %3330 = shalt.err (!%p3327_p8)
}
 0xcca   : > { %s3331_s8 = scalar_lea.hbm %s2501_s22, 32  ;;  %s3335_s16 = scalar_lea.hbm %s4328_s13, 128 }
 0xccb   : > { %p3332_p10 = scmp.ne.s32.totalorder %s2501_s22, %s3331_s8  ;;  %p3336_p5 = scmp.lt.s32.totalorder %s2501_s22, %s4328_s13 }
 0xccc   : > { %p3337_p7 = scmp.lt.s32.totalorder %s3335_s16, %s3331_s8 }
 0xccd   : > { %p3333_p11 = pnand %p3332_p10, %p4556_p0 }
 0xcce   : > { %p3338_p12 = por %p3337_p7, %p3336_p5 }
 0xccf   : > { %p3334_p4 = pneg %p3333_p11 }
 0xcd1   : > { %p3339_p13 = pnand %p3338_p12, %p3334_p4 }
 0xcd3   : > { %3342 = shalt.err (!%p3339_p13)
}
 0xcd4   : > { %2935 = dma.vmem_to_hbm [thread:$0]  (%p4556_p0), %s2504_s18, 32, %s2501_s22, %s2490_s9  }
 0xcd5 PF: > { %s4557_s19 = sld [smem:[#allocation20_spill]]  ;;  %p2970_p2 = scmp.ge.s32.totalorder %s3397_s28, 2 }
 0xcd6   : > { %s4558_s20 = sld [smem:[#allocation22_spill]] }
 0xcdb   : > { %s2515_s11 = sand.u32 1, %s4557_s19  }
 0xcdc   : > { %p4559_p9 = scmp.ne.s32.totalorder %s4558_s20, 0  ;;  %s2516_s15 = scalar_lea.sflag [#allocation4], %s2515_s11 }
 0xcde   : > { %p2958_p1 = pnand %p2970_p2, %p4559_p9 }
 0xce0   : > { %p2959_p6 = pneg %p2958_p1 }
 0xce2   : > { %3380 = dma.done.wait (%p2959_p6), %s2516_s15, 32  }
 0xce3   : > { %3382 = vsyncadd (%p2959_p6), %s2516_s15, 4294967264  ;;  %s4560_s28 = sld [smem:[#allocation23_spill]]  ;;  %s4563_s25 = smov %s3389_s26 }
 0xce4   : > { %s4561_s27 = sld [smem:[#allocation21_spill]] }
 0xce5   : > { %s4562_s23 = sld [smem:[#allocation24_spill]] }
 0xce9   : > { %p31_p3 = scmp.ge.s32.totalorder %s4560_s28, 6  }
 0xcea   : > { %s4564_s26 = smov %s4561_s27 }
 0xceb   : > { %s4565_s27 = smov %s4562_s23  ;;  %33 = sbr.rel (!%p31_p3) target bundleno = 15 (0xf), region = 155 }
 0xcf0   :  { %2521 = vsyncpa [#allocation3], 1 }
 0xcf1   :  { %2523 = vsyncpa [#allocation3 + $0x1], 1 }
 0xcf2   :  { %2524 = vsyncpa [#allocation6], 1 }
 0xcf3   :  { %2526 = vsyncpa [#allocation6 + $0x1], 1 }
 0xcf4   :  { %2527 = vsyncpa [#allocation9], 1 }
 0xcf5   :  { %2528 = vsyncpa [#allocation12], 1 }
 0xcf6   :  { %2529 = vsyncpa [#allocation4], 1 }
 0xcf7   :  { %2531 = vsyncpa [#allocation4 + $0x1], 1 }

</bundles_post_ra>
